<compile_context>
chip_gen: v7x
topology: tpu7x:2x2x1
jax: 0.10.0
libtpu: 0.0.40
codegen_flags: <defaults>
</compile_context>

<pallas_src>
import functools

import jax
import jax.numpy as jnp
from jax.experimental import pallas as pl
from jax.experimental.pallas import tpu as pltpu

LANE = 128


def _round_up(v, m):
    return ((v + m - 1) // m) * m


def _pad2d(x, rows, cols):
    return jnp.pad(x, ((0, rows - x.shape[0]), (0, cols - x.shape[1])))


def _pick_tiles(n):
    """Row tile (target 512-1024, keep >= 2 row tiles for v7x megacore) and
    reduction tile (target 512, a multiple of 256 for the 256-wide MXU)."""
    tm = 1024
    while tm > 128 and (n % tm != 0 or n // tm < 2):
        tm //= 2
    tm = min(tm, n)
    tk = 512
    while tk > 128 and n % tk != 0:
        tk //= 2
    tk = min(tk, n)
    return tm, tk


# ---------------------------------------------------------------------------
# Pallas kernels
# ---------------------------------------------------------------------------

def _feat_kernel_plain(x_ref, ws_ref, wn_ref, hself_ref, xw_ref):
    """h_self = x @ Ws ; xw = x @ Wn (weights pre-transposed to (d_in, d_out))."""
    x = x_ref[...]
    hself_ref[...] = jnp.dot(
        x, ws_ref[...], preferred_element_type=jnp.float32).astype(hself_ref.dtype)
    xw_ref[...] = jnp.dot(
        x, wn_ref[...], preferred_element_type=jnp.float32).astype(xw_ref.dtype)


def _feat_kernel_bn_relu(x_ref, scale_ref, shift_ref, ws_ref, wn_ref,
                         hself_ref, xw_ref):
    """Fused pre-folded BatchNorm (y = x*scale + shift) + ReLU + both feature matmuls."""
    # TODO(synk): training-mode dropout (stochastic masking) not implemented; eval-mode identity.
    xn = jnp.maximum(x_ref[...] * scale_ref[...] + shift_ref[...], 0.0)
    hself_ref[...] = jnp.dot(
        xn, ws_ref[...], preferred_element_type=jnp.float32).astype(hself_ref.dtype)
    xw_ref[...] = jnp.dot(
        xn, wn_ref[...], preferred_element_type=jnp.float32).astype(xw_ref.dtype)


def _adj_matmul_kernel(adj_ref, xw_ref, hself_ref, rdeg_ref, o_ref, *stat_refs,
                       n_valid_cols, apply_log_softmax, emit_stats):
    """out[i] = h_self[i] + rdeg[i] * sum_k A01[i,k] @ xw[k].

    The f32 output block itself is the accumulator (its index_map is constant along
    the reduction axis, so it stays resident in VMEM); no scratch accumulator.
    Optional fused epilogues: log_softmax (last layer) or per-row-tile BatchNorm
    partial statistics (intermediate layers).
    """
    k = pl.program_id(1)

    @pl.when(k == 0)
    def _():
        o_ref[...] = jnp.zeros_like(o_ref)

    a = adj_ref[...].astype(jnp.bfloat16)   # int8 {0,1} -> bf16 MXU operand (cheap VPU convert)
    o_ref[...] += jnp.dot(a, xw_ref[...], preferred_element_type=jnp.float32)

    @pl.when(k == pl.num_programs(1) - 1)
    def _():
        y = hself_ref[...].astype(jnp.float32) + rdeg_ref[...] * o_ref[...]
        if apply_log_softmax:
            col = jax.lax.broadcasted_iota(jnp.int32, y.shape, 1)
            ymask = jnp.where(col < n_valid_cols, y, -jnp.inf)
            m = jnp.max(ymask, axis=-1, keepdims=True)
            ex = jnp.exp(ymask - m)                       # padded cols -> exp(-inf) = 0
            y = y - m - jnp.log(jnp.sum(ex, axis=-1, keepdims=True))
        o_ref[...] = y
        if emit_stats:
            psum_ref, psq_ref = stat_refs
            psum_ref[...] = jnp.sum(y, axis=0, keepdims=True)[None]
            psq_ref[...] = jnp.sum(y * y, axis=0, keepdims=True)[None]


# ---------------------------------------------------------------------------
# Wrappers
# ---------------------------------------------------------------------------

def sage_feature_transform(x, ws_t, wn_t, bn_scale_shift=None, *, tm):
    """Row-tiled: (optional folded BN+ReLU) then h_self = x@Ws and xw = x@Wn (bf16 out)."""
    n, d_in = x.shape
    d_out = ws_t.shape[1]
    assert n % tm == 0
    grid = (n // tm,)
    x_spec = pl.BlockSpec((tm, d_in), lambda i: (i, 0))
    w_spec = pl.BlockSpec((d_in, d_out), lambda i: (0, 0))
    row_spec = pl.BlockSpec((1, d_in), lambda i: (0, 0))
    out_specs = [pl.BlockSpec((tm, d_out), lambda i: (i, 0)),
                 pl.BlockSpec((tm, d_out), lambda i: (i, 0))]
    out_shape = [jax.ShapeDtypeStruct((n, d_out), jnp.bfloat16),   # h_self (bf16 stream)
                 jax.ShapeDtypeStruct((n, d_out), jnp.bfloat16)]   # x @ Wn (bf16 MXU operand)
    cp = pltpu.CompilerParams(dimension_semantics=("parallel",))
    if bn_scale_shift is None:
        return pl.pallas_call(
            _feat_kernel_plain, grid=grid,
            in_specs=[x_spec, w_spec, w_spec],
            out_specs=out_specs, out_shape=out_shape, compiler_params=cp,
        )(x, ws_t, wn_t)
    scale, shift = bn_scale_shift
    return pl.pallas_call(
        _feat_kernel_bn_relu, grid=grid,
        in_specs=[x_spec, row_spec, row_spec, w_spec, w_spec],
        out_specs=out_specs, out_shape=out_shape, compiler_params=cp,
    )(x, scale, shift, ws_t, wn_t)


def sage_aggregate(adj01, xw, h_self, rdeg, *, tm, tk, n_valid_cols=0,
                   apply_log_softmax=False, emit_stats=False):
    """Tiled h_self + rdeg * (A01 @ xw) with the f32 output block as accumulator."""
    n = adj01.shape[0]
    d_out = xw.shape[1]
    # TODO(synk): if N is ever padded to a tile multiple, mask padded rows out of the
    # fused BN statistics (today N % tm == 0 exactly, so all rows are valid).
    assert n % tm == 0 and n % tk == 0
    grid = (n // tm, n // tk)
    kernel = functools.partial(
        _adj_matmul_kernel, n_valid_cols=n_valid_cols,
        apply_log_softmax=apply_log_softmax, emit_stats=emit_stats)
    in_specs = [pl.BlockSpec((tm, tk), lambda i, k: (i, k)),        # A01 tile (int8)
                pl.BlockSpec((tk, d_out), lambda i, k: (k, 0)),     # xW_neigh tile (bf16)
                pl.BlockSpec((tm, d_out), lambda i, k: (i, 0)),     # h_self tile (bf16)
                pl.BlockSpec((tm, 1), lambda i, k: (i, 0))]         # 1/in-degree (f32)
    out_specs = [pl.BlockSpec((tm, d_out), lambda i, k: (i, 0))]
    out_shape = [jax.ShapeDtypeStruct((n, d_out), jnp.float32)]
    if emit_stats:
        stat_spec = pl.BlockSpec((1, 1, d_out), lambda i, k: (i, 0, 0))
        out_specs += [stat_spec, stat_spec]
        out_shape += [jax.ShapeDtypeStruct((n // tm, 1, d_out), jnp.float32)] * 2

    flops = 2 * n * n * d_out
    bytes_accessed = (n * n                          # int8 adjacency stream
                      + (n // tm) * n * d_out * 2    # xw re-read per row tile (bf16)
                      + n * d_out * 2                # h_self (bf16)
                      + n * 4                        # rdeg
                      + n * d_out * 4)               # f32 output
    cost = pl.CostEstimate(flops=flops,
                           transcendentals=(n * d_out if apply_log_softmax else 0),
                           bytes_accessed=bytes_accessed)

    out = pl.pallas_call(
        kernel, grid=grid,
        in_specs=in_specs, out_specs=out_specs, out_shape=out_shape,
        cost_estimate=cost,
        compiler_params=pltpu.CompilerParams(
            dimension_semantics=("parallel", "arbitrary")),
    )(adj01, xw, h_self, rdeg)
    if emit_stats:
        return out
    return out[0]


def bn_fold_scale_shift(psum, psq, gamma, beta, n_rows, eps=1e-5):
    """Fold training-mode BatchNorm1d into y = x*scale + shift (plain JAX, tiny arrays).

    TODO(synk): E[x^2]-E[x]^2 can cancel for large-mean activations; use a two-pass /
    Welford scheme if activations grow.
    """
    s = jnp.sum(psum, axis=0)          # (1, d)
    sq = jnp.sum(psq, axis=0)          # (1, d)
    mean = s / n_rows
    var = jnp.maximum(sq / n_rows - mean * mean, 0.0)
    rstd = jax.lax.rsqrt(var + eps)
    scale = rstd * gamma
    shift = beta - mean * scale
    return scale, shift


# ---------------------------------------------------------------------------
# GraphSAGE model (parameter init + forward orchestration)
# ---------------------------------------------------------------------------

def xavier_uniform(key, out_feats, in_feats, gain):
    # matches nn.init.xavier_uniform_ on nn.Linear.weight of shape (out, in)
    bound = gain * jnp.sqrt(6.0 / (in_feats + out_feats))
    return jax.random.uniform(
        key, (out_feats, in_feats), minval=-bound, maxval=bound, dtype=jnp.float32)


def init_graphsage_params(key, in_feats, hidden_feats, out_feats, num_layers):
    gain = float(jnp.sqrt(2.0))  # calculate_gain('relu')
    dims = [in_feats] + [hidden_feats] * (num_layers - 1) + [out_feats]
    params = {"layers": [], "bns": []}
    for i in range(num_layers):
        key, k1, k2 = jax.random.split(key, 3)
        d_in, d_out = dims[i], dims[i + 1]
        d_in_p, d_out_p = _round_up(d_in, LANE), _round_up(d_out, LANE)
        w_self = xavier_uniform(k1, d_out, d_in, gain)
        w_neigh = xavier_uniform(k2, d_out, d_in, gain)
        params["layers"].append({
            # pre-transposed to (in, out) and zero-padded to lane multiples
            "ws_t": _pad2d(w_self.T, d_in_p, d_out_p),
            "wn_t": _pad2d(w_neigh.T, d_in_p, d_out_p),
        })
        if i < num_layers - 1:
            params["bns"].append({
                "gamma": _pad2d(jnp.ones((1, d_out), jnp.float32), 1, d_out_p),
                "beta": _pad2d(jnp.zeros((1, d_out), jnp.float32), 1, d_out_p),
            })
    return params


def graphsage_forward(params, adj01, rdeg, x_pad, *, n_nodes, out_feats, tm, tk):
    num_layers = len(params["layers"])
    bn_state = None
    h = x_pad
    for i in range(num_layers):
        lp = params["layers"][i]
        h_self, xw = sage_feature_transform(h, lp["ws_t"], lp["wn_t"],
                                            bn_scale_shift=bn_state, tm=tm)
        is_last = (i == num_layers - 1)
        if is_last:
            h = sage_aggregate(adj01, xw, h_self, rdeg, tm=tm, tk=tk,
                               n_valid_cols=out_feats, apply_log_softmax=True)
        else:
            h, psum, psq = sage_aggregate(adj01, xw, h_self, rdeg, tm=tm, tk=tk,
                                          emit_stats=True)
            bn = params["bns"][i]
            bn_state = bn_fold_scale_shift(psum, psq, bn["gamma"], bn["beta"], n_nodes)
    return h[:, :out_feats]


def build_graph(key, num_nodes, edge_prob=0.1):
    """Dense random directed graph. Returns (A01 int8 dst-by-src, 1/in-degree (N,1) f32)."""
    a = jax.random.uniform(key, (num_nodes, num_nodes)) < edge_prob
    a = jnp.logical_and(a, ~jnp.eye(num_nodes, dtype=bool))          # no self loops
    a01 = a.astype(jnp.int8)                                          # half the bytes of bf16
    in_deg = jnp.sum(a01.astype(jnp.float32), axis=1, keepdims=True)
    # nodes with no in-edges get a zero "neigh" vector, like DGL's mean reducer
    rdeg = jnp.where(in_deg > 0, 1.0 / jnp.maximum(in_deg, 1.0), 0.0)
    return a01, rdeg.astype(jnp.float32)


def reference_forward(params, adj01, rdeg, x_pad, n_nodes, out_feats):
    """Pure-JAX reference mirroring the kernel math (same bf16 casts / padding / rdeg fold)."""
    a_bf = adj01.astype(jnp.bfloat16)
    num_layers = len(params["layers"])
    bn_state = None
    h = x_pad
    for i in range(num_layers):
        lp = params["layers"][i]
        xn = h
        if bn_state is not None:
            scale, shift = bn_state
            xn = jnp.maximum(h * scale + shift, 0.0)
        h_self = jnp.dot(xn, lp["ws_t"],
                         preferred_element_type=jnp.float32).astype(jnp.bfloat16)
        xw = jnp.dot(xn, lp["wn_t"],
                     preferred_element_type=jnp.float32).astype(jnp.bfloat16)
        h = (h_self.astype(jnp.float32)
             + rdeg * jnp.dot(a_bf, xw, preferred_element_type=jnp.float32))
        if i < num_layers - 1:
            mean = jnp.sum(h, axis=0, keepdims=True) / n_nodes
            var = jnp.maximum(jnp.sum(h * h, axis=0, keepdims=True) / n_nodes
                              - mean * mean, 0.0)
            rstd = jax.lax.rsqrt(var + 1e-5)
            bn = params["bns"][i]
            scale = rstd * bn["gamma"]
            shift = bn["beta"] - mean * scale
            bn_state = (scale, shift)
    return jax.nn.log_softmax(h[:, :out_feats], axis=-1)


# ---------------------------------------------------------------------------
# Main
# ---------------------------------------------------------------------------

if __name__ == "__main__":
    key = jax.random.PRNGKey(0)
    k_graph, k_feat, k_params = jax.random.split(key, 3)

    # Small synthetic shapes consistent with the module: N nodes, D_in features.
    num_nodes = 256
    in_feats = 16
    hidden_feats = 32
    out_feats = 8
    num_layers = 3
    dropout = 0.5  # unused (eval-mode forward)

    tm, tk = _pick_tiles(num_nodes)   # (128, 256) at this demo size; 512-1024 / 512 at real scale

    adj01, rdeg = build_graph(k_graph, num_nodes)
    x = jax.random.normal(k_feat, (num_nodes, in_feats), dtype=jnp.float32)
    x_pad = _pad2d(x, num_nodes, _round_up(in_feats, LANE))
    params = init_graphsage_params(k_params, in_feats, hidden_feats, out_feats, num_layers)

    fwd = jax.jit(functools.partial(graphsage_forward, n_nodes=float(num_nodes),
                                    out_feats=out_feats, tm=tm, tk=tk))
    out = jax.block_until_ready(fwd(params, adj01, rdeg, x_pad))

    assert out.shape == (num_nodes, out_feats)
    assert bool(jnp.all(jnp.isfinite(out)))
    # log-softmax rows should sum (in prob space) to ~1
    assert bool(jnp.allclose(jnp.sum(jnp.exp(out), axis=-1), 1.0, atol=1e-4))
    # kernel vs pure-JAX reference (loose tol: bf16 operands, different accumulation order)
    ref = reference_forward(params, adj01, rdeg, x_pad, float(num_nodes), out_feats)
    err = float(jnp.max(jnp.abs(out - ref)))
    assert err < 1e-1, err

    print("KERNEL_OK")
</pallas_src>

<mosaic_0001>
module attributes {stable_mosaic.version = 11 : i64} {
  func.func @_feat_kernel_plain(%arg0: i32, %arg1: memref<128x128xf32, #tpu.memory_space<vmem>>, %arg2: memref<128x128xf32, #tpu.memory_space<vmem>>, %arg3: memref<128x128xf32, #tpu.memory_space<vmem>>, %arg4: memref<128x128xbf16, #tpu.memory_space<vmem>>, %arg5: memref<128x128xbf16, #tpu.memory_space<vmem>>) attributes {dimension_semantics = [#tpu.dimension_semantics<parallel>], iteration_bounds = array<i64: 2>, scalar_prefetch = 0 : i64, scratch_operands = 0 : i64, tpu.core_type = #tpu.core_type<tc>, window_params = [{transform_indices = @transform_0, window_bounds = array<i64: 128, 128>}, {pipeline_mode = #tpu.pipeline_mode<synchronous>, transform_indices = @transform_1, window_bounds = array<i64: 128, 128>}, {pipeline_mode = #tpu.pipeline_mode<synchronous>, transform_indices = @transform_2, window_bounds = array<i64: 128, 128>}, {transform_indices = @transform_3, window_bounds = array<i64: 128, 128>}, {transform_indices = @transform_4, window_bounds = array<i64: 128, 128>}]} {
    %c0 = arith.constant 0 : index
    %c0_0 = arith.constant 0 : index
    %0 = vector.load %arg1[%c0, %c0_0] : memref<128x128xf32, #tpu.memory_space<vmem>>, vector<128x128xf32>
    %c0_1 = arith.constant 0 : index
    %c0_2 = arith.constant 0 : index
    %1 = vector.load %arg2[%c0_1, %c0_2] : memref<128x128xf32, #tpu.memory_space<vmem>>, vector<128x128xf32>
    %cst = arith.constant dense<0.000000e+00> : vector<128x128xf32>
    %2 = tpu.matmul %0, %1, %cst {dimension_numbers = #tpu.dot_dimension_numbers<[1], [0], [0], [1], [0, 0, 1, 1], [], []>} : vector<128x128xf32>, vector<128x128xf32>, vector<128x128xf32> -> vector<128x128xf32>
    %3 = arith.truncf %2 : vector<128x128xf32> to vector<128x128xbf16>
    %c0_3 = arith.constant 0 : index
    %c0_4 = arith.constant 0 : index
    %4 = vector.load %arg4[%c0_3, %c0_4] : memref<128x128xbf16, #tpu.memory_space<vmem>>, vector<128x128xbf16>
    tpu.vector_store %arg4[%c0_3, %c0_4], %3 {strides = array<i32>} : memref<128x128xbf16, #tpu.memory_space<vmem>>, vector<128x128xbf16>,
    %c0_5 = arith.constant 0 : index
    %c0_6 = arith.constant 0 : index
    %5 = vector.load %arg3[%c0_5, %c0_6] : memref<128x128xf32, #tpu.memory_space<vmem>>, vector<128x128xf32>
    %cst_7 = arith.constant dense<0.000000e+00> : vector<128x128xf32>
    %6 = tpu.matmul %0, %5, %cst_7 {dimension_numbers = #tpu.dot_dimension_numbers<[1], [0], [0], [1], [0, 0, 1, 1], [], []>} : vector<128x128xf32>, vector<128x128xf32>, vector<128x128xf32> -> vector<128x128xf32>
    %7 = arith.truncf %6 : vector<128x128xf32> to vector<128x128xbf16>
    %c0_8 = arith.constant 0 : index
    %c0_9 = arith.constant 0 : index
    %8 = vector.load %arg5[%c0_8, %c0_9] : memref<128x128xbf16, #tpu.memory_space<vmem>>, vector<128x128xbf16>
    tpu.vector_store %arg5[%c0_8, %c0_9], %7 {strides = array<i32>} : memref<128x128xbf16, #tpu.memory_space<vmem>>, vector<128x128xbf16>,
    return
  }
  func.func @transform_0(%arg0: i32) -> (i32, i32) {
    %c0_i32 = arith.constant 0 : i32
    %c0_i32_0 = arith.constant 0 : i32
    return %arg0, %c0_i32 : i32, i32
  }
  func.func @transform_1(%arg0: i32) -> (i32, i32) {
    %c0_i32 = arith.constant 0 : i32
    %c0_i32_0 = arith.constant 0 : i32
    %c0_i32_1 = arith.constant 0 : i32
    return %c0_i32, %c0_i32_0 : i32, i32
  }
  func.func @transform_2(%arg0: i32) -> (i32, i32) {
    %c0_i32 = arith.constant 0 : i32
    %c0_i32_0 = arith.constant 0 : i32
    %c0_i32_1 = arith.constant 0 : i32
    return %c0_i32, %c0_i32_0 : i32, i32
  }
  func.func @transform_3(%arg0: i32) -> (i32, i32) {
    %c0_i32 = arith.constant 0 : i32
    %c0_i32_0 = arith.constant 0 : i32
    return %arg0, %c0_i32 : i32, i32
  }
  func.func @transform_4(%arg0: i32) -> (i32, i32) {
    %c0_i32 = arith.constant 0 : i32
    %c0_i32_0 = arith.constant 0 : i32
    return %arg0, %c0_i32 : i32, i32
  }
}

module attributes {stable_mosaic.version = 11 : i64} {
  func.func @_adj_matmul_kernel(%arg0: i32, %arg1: i32, %arg2: memref<128x256xi8, #tpu.memory_space<vmem>>, %arg3: memref<256x128xbf16, #tpu.memory_space<vmem>>, %arg4: memref<128x128xbf16, #tpu.memory_space<vmem>>, %arg5: memref<128x1xf32, #tpu.memory_space<vmem>>, %arg6: memref<128x128xf32, #tpu.memory_space<vmem>>, %arg7: memref<1x1x128xf32, #tpu.memory_space<vmem>>, %arg8: memref<1x1x128xf32, #tpu.memory_space<vmem>>) attributes {dimension_semantics = [#tpu.dimension_semantics<parallel>, #tpu.dimension_semantics<arbitrary>], iteration_bounds = array<i64: 2, 1>, scalar_prefetch = 0 : i64, scratch_operands = 0 : i64, tpu.core_type = #tpu.core_type<tc>, window_params = [{transform_indices = @transform_0, window_bounds = array<i64: 128, 256>}, {transform_indices = @transform_1, window_bounds = array<i64: 256, 128>}, {transform_indices = @transform_2, window_bounds = array<i64: 128, 128>}, {transform_indices = @transform_3, window_bounds = array<i64: 128, 1>}, {transform_indices = @transform_4, window_bounds = array<i64: 128, 128>}, {transform_indices = @transform_5, window_bounds = array<i64: 1, 1, 128>}, {transform_indices = @transform_6, window_bounds = array<i64: 1, 1, 128>}]} {
    %c0_i32 = arith.constant 0 : i32
    %0 = arith.cmpi eq, %arg1, %c0_i32 : i32
    %1 = arith.extui %0 : i1 to i32
    %c0_i32_0 = arith.constant 0 : i32
    %2 = arith.cmpi ne, %1, %c0_i32_0 : i32
    scf.if %2 {
      %cst_10 = arith.constant 0.000000e+00 : f32
      %13 = vector.broadcast %cst_10 : f32 to vector<128x128xf32>
      %c0_11 = arith.constant 0 : index
      %c0_12 = arith.constant 0 : index
      %14 = vector.load %arg6[%c0_11, %c0_12] : memref<128x128xf32, #tpu.memory_space<vmem>>, vector<128x128xf32>
      tpu.vector_store %arg6[%c0_11, %c0_12], %13 {strides = array<i32>} : memref<128x128xf32, #tpu.memory_space<vmem>>, vector<128x128xf32>,
    } else {
    }
    %c0 = arith.constant 0 : index
    %c0_1 = arith.constant 0 : index
    %3 = vector.load %arg2[%c0, %c0_1] : memref<128x256xi8, #tpu.memory_space<vmem>>, vector<128x256xi8>
    %4 = arith.sitofp %3 : vector<128x256xi8> to vector<128x256xbf16>
    %c0_2 = arith.constant 0 : index
    %c0_3 = arith.constant 0 : index
    %5 = vector.load %arg6[%c0_2, %c0_3] : memref<128x128xf32, #tpu.memory_space<vmem>>, vector<128x128xf32>
    %c0_4 = arith.constant 0 : index
    %c0_5 = arith.constant 0 : index
    %6 = vector.load %arg3[%c0_4, %c0_5] : memref<256x128xbf16, #tpu.memory_space<vmem>>, vector<256x128xbf16>
    %cst = arith.constant dense<0.000000e+00> : vector<128x128xf32>
    %7 = tpu.matmul %4, %6, %cst {dimension_numbers = #tpu.dot_dimension_numbers<[1], [0], [0], [1], [0, 0, 1, 1], [], []>} : vector<128x256xbf16>, vector<256x128xbf16>, vector<128x128xf32> -> vector<128x128xf32>
    %8 = arith.addf %5, %7 : vector<128x128xf32>
    %c0_6 = arith.constant 0 : index
    %c0_7 = arith.constant 0 : index
    %9 = vector.load %arg6[%c0_6, %c0_7] : memref<128x128xf32, #tpu.memory_space<vmem>>, vector<128x128xf32>
    tpu.vector_store %arg6[%c0_6, %c0_7], %8 {strides = array<i32>} : memref<128x128xf32, #tpu.memory_space<vmem>>, vector<128x128xf32>,
    %c0_i32_8 = arith.constant 0 : i32
    %10 = arith.cmpi eq, %arg1, %c0_i32_8 : i32
    %11 = arith.extui %10 : i1 to i32
    %c0_i32_9 = arith.constant 0 : i32
    %12 = arith.cmpi ne, %11, %c0_i32_9 : i32
    scf.if %12 {
      %c0_10 = arith.constant 0 : index
      %c0_11 = arith.constant 0 : index
      %13 = vector.load %arg4[%c0_10, %c0_11] : memref<128x128xbf16, #tpu.memory_space<vmem>>, vector<128x128xbf16>
      %14 = arith.extf %13 : vector<128x128xbf16> to vector<128x128xf32>
      %c0_12 = arith.constant 0 : index
      %c0_13 = arith.constant 0 : index
      %15 = vector.load %arg5[%c0_12, %c0_13] : memref<128x1xf32, #tpu.memory_space<vmem>>, vector<128x1xf32>
      %c0_14 = arith.constant 0 : index
      %c0_15 = arith.constant 0 : index
      %16 = vector.load %arg6[%c0_14, %c0_15] : memref<128x128xf32, #tpu.memory_space<vmem>>, vector<128x128xf32>
      %17 = vector.broadcast %15 : vector<128x1xf32> to vector<128x128xf32>
      %18 = arith.mulf %17, %16 : vector<128x128xf32>
      %19 = arith.addf %14, %18 : vector<128x128xf32>
      %c0_16 = arith.constant 0 : index
      %c0_17 = arith.constant 0 : index
      %20 = vector.load %arg6[%c0_16, %c0_17] : memref<128x128xf32, #tpu.memory_space<vmem>>, vector<128x128xf32>
      tpu.vector_store %arg6[%c0_16, %c0_17], %19 {strides = array<i32>} : memref<128x128xf32, #tpu.memory_space<vmem>>, vector<128x128xf32>,
      %cst_18 = arith.constant dense<0.000000e+00> : vector<128xf32>
      %21 = vector.multi_reduction <add>, %19, %cst_18 [0] : vector<128x128xf32> to vector<128xf32>
      %22 = vector.shape_cast %21 : vector<128xf32> to vector<1x128xf32>
      %23 = vector.shape_cast %22 : vector<1x128xf32> to vector<1x1x128xf32>
      %c0_19 = arith.constant 0 : index
      %c0_20 = arith.constant 0 : index
      %c0_21 = arith.constant 0 : index
      %24 = vector.load %arg7[%c0_19, %c0_20, %c0_21] : memref<1x1x128xf32, #tpu.memory_space<vmem>>, vector<1x1x128xf32>
      tpu.vector_store %arg7[%c0_19, %c0_20, %c0_21], %23 {strides = array<i32>} : memref<1x1x128xf32, #tpu.memory_space<vmem>>, vector<1x1x128xf32>,
      %25 = arith.mulf %19, %19 : vector<128x128xf32>
      %cst_22 = arith.constant dense<0.000000e+00> : vector<128xf32>
      %26 = vector.multi_reduction <add>, %25, %cst_22 [0] : vector<128x128xf32> to vector<128xf32>
      %27 = vector.shape_cast %26 : vector<128xf32> to vector<1x128xf32>
      %28 = vector.shape_cast %27 : vector<1x128xf32> to vector<1x1x128xf32>
      %c0_23 = arith.constant 0 : index
      %c0_24 = arith.constant 0 : index
      %c0_25 = arith.constant 0 : index
      %29 = vector.load %arg8[%c0_23, %c0_24, %c0_25] : memref<1x1x128xf32, #tpu.memory_space<vmem>>, vector<1x1x128xf32>
      tpu.vector_store %arg8[%c0_23, %c0_24, %c0_25], %28 {strides = array<i32>} : memref<1x1x128xf32, #tpu.memory_space<vmem>>, vector<1x1x128xf32>,
    } else {
    }
    return
  }
  func.func @transform_0(%arg0: i32, %arg1: i32) -> (i32, i32) {
    %c0_i32 = arith.constant 0 : i32
    return %arg0, %arg1 : i32, i32
  }
  func.func @transform_1(%arg0: i32, %arg1: i32) -> (i32, i32) {
    %c0_i32 = arith.constant 0 : i32
    %c0_i32_0 = arith.constant 0 : i32
    return %arg1, %c0_i32 : i32, i32
  }
  func.func @transform_2(%arg0: i32, %arg1: i32) -> (i32, i32) {
    %c0_i32 = arith.constant 0 : i32
    %c0_i32_0 = arith.constant 0 : i32
    return %arg0, %c0_i32 : i32, i32
  }
  func.func @transform_3(%arg0: i32, %arg1: i32) -> (i32, i32) {
    %c0_i32 = arith.constant 0 : i32
    %c0_i32_0 = arith.constant 0 : i32
    return %arg0, %c0_i32 : i32, i32
  }
  func.func @transform_4(%arg0: i32, %arg1: i32) -> (i32, i32) {
    %c0_i32 = arith.constant 0 : i32
    %c0_i32_0 = arith.constant 0 : i32
    return %arg0, %c0_i32 : i32, i32
  }
  func.func @transform_5(%arg0: i32, %arg1: i32) -> (i32, i32, i32) {
    %c0_i32 = arith.constant 0 : i32
    %c0_i32_0 = arith.constant 0 : i32
    %c0_i32_1 = arith.constant 0 : i32
    return %arg0, %c0_i32, %c0_i32_0 : i32, i32, i32
  }
  func.func @transform_6(%arg0: i32, %arg1: i32) -> (i32, i32, i32) {
    %c0_i32 = arith.constant 0 : i32
    %c0_i32_0 = arith.constant 0 : i32
    %c0_i32_1 = arith.constant 0 : i32
    return %arg0, %c0_i32, %c0_i32_0 : i32, i32, i32
  }
}

module attributes {stable_mosaic.version = 11 : i64} {
  func.func @_feat_kernel_bn_relu(%arg0: i32, %arg1: memref<128x128xf32, #tpu.memory_space<vmem>>, %arg2: memref<1x128xf32, #tpu.memory_space<vmem>>, %arg3: memref<1x128xf32, #tpu.memory_space<vmem>>, %arg4: memref<128x128xf32, #tpu.memory_space<vmem>>, %arg5: memref<128x128xf32, #tpu.memory_space<vmem>>, %arg6: memref<128x128xbf16, #tpu.memory_space<vmem>>, %arg7: memref<128x128xbf16, #tpu.memory_space<vmem>>) attributes {dimension_semantics = [#tpu.dimension_semantics<parallel>], iteration_bounds = array<i64: 2>, scalar_prefetch = 0 : i64, scratch_operands = 0 : i64, tpu.core_type = #tpu.core_type<tc>, window_params = [{transform_indices = @transform_0, window_bounds = array<i64: 128, 128>}, {pipeline_mode = #tpu.pipeline_mode<synchronous>, transform_indices = @transform_1, window_bounds = array<i64: 1, 128>}, {pipeline_mode = #tpu.pipeline_mode<synchronous>, transform_indices = @transform_2, window_bounds = array<i64: 1, 128>}, {pipeline_mode = #tpu.pipeline_mode<synchronous>, transform_indices = @transform_3, window_bounds = array<i64: 128, 128>}, {pipeline_mode = #tpu.pipeline_mode<synchronous>, transform_indices = @transform_4, window_bounds = array<i64: 128, 128>}, {transform_indices = @transform_5, window_bounds = array<i64: 128, 128>}, {transform_indices = @transform_6, window_bounds = array<i64: 128, 128>}]} {
    %c0 = arith.constant 0 : index
    %c0_0 = arith.constant 0 : index
    %0 = vector.load %arg1[%c0, %c0_0] : memref<128x128xf32, #tpu.memory_space<vmem>>, vector<128x128xf32>
    %c0_1 = arith.constant 0 : index
    %c0_2 = arith.constant 0 : index
    %1 = vector.load %arg2[%c0_1, %c0_2] : memref<1x128xf32, #tpu.memory_space<vmem>>, vector<1x128xf32>
    %2 = vector.broadcast %1 : vector<1x128xf32> to vector<128x128xf32>
    %3 = arith.mulf %0, %2 : vector<128x128xf32>
    %c0_3 = arith.constant 0 : index
    %c0_4 = arith.constant 0 : index
    %4 = vector.load %arg3[%c0_3, %c0_4] : memref<1x128xf32, #tpu.memory_space<vmem>>, vector<1x128xf32>
    %5 = vector.broadcast %4 : vector<1x128xf32> to vector<128x128xf32>
    %6 = arith.addf %3, %5 : vector<128x128xf32>
    %cst = arith.constant 0.000000e+00 : f32
    %7 = vector.broadcast %cst : f32 to vector<128x128xf32>
    %8 = arith.maximumf %6, %7 : vector<128x128xf32>
    %c0_5 = arith.constant 0 : index
    %c0_6 = arith.constant 0 : index
    %9 = vector.load %arg4[%c0_5, %c0_6] : memref<128x128xf32, #tpu.memory_space<vmem>>, vector<128x128xf32>
    %cst_7 = arith.constant dense<0.000000e+00> : vector<128x128xf32>
    %10 = tpu.matmul %8, %9, %cst_7 {dimension_numbers = #tpu.dot_dimension_numbers<[1], [0], [0], [1], [0, 0, 1, 1], [], []>} : vector<128x128xf32>, vector<128x128xf32>, vector<128x128xf32> -> vector<128x128xf32>
    %11 = arith.truncf %10 : vector<128x128xf32> to vector<128x128xbf16>
    %c0_8 = arith.constant 0 : index
    %c0_9 = arith.constant 0 : index
    %12 = vector.load %arg6[%c0_8, %c0_9] : memref<128x128xbf16, #tpu.memory_space<vmem>>, vector<128x128xbf16>
    tpu.vector_store %arg6[%c0_8, %c0_9], %11 {strides = array<i32>} : memref<128x128xbf16, #tpu.memory_space<vmem>>, vector<128x128xbf16>,
    %c0_10 = arith.constant 0 : index
    %c0_11 = arith.constant 0 : index
    %13 = vector.load %arg5[%c0_10, %c0_11] : memref<128x128xf32, #tpu.memory_space<vmem>>, vector<128x128xf32>
    %cst_12 = arith.constant dense<0.000000e+00> : vector<128x128xf32>
    %14 = tpu.matmul %8, %13, %cst_12 {dimension_numbers = #tpu.dot_dimension_numbers<[1], [0], [0], [1], [0, 0, 1, 1], [], []>} : vector<128x128xf32>, vector<128x128xf32>, vector<128x128xf32> -> vector<128x128xf32>
    %15 = arith.truncf %14 : vector<128x128xf32> to vector<128x128xbf16>
    %c0_13 = arith.constant 0 : index
    %c0_14 = arith.constant 0 : index
    %16 = vector.load %arg7[%c0_13, %c0_14] : memref<128x128xbf16, #tpu.memory_space<vmem>>, vector<128x128xbf16>
    tpu.vector_store %arg7[%c0_13, %c0_14], %15 {strides = array<i32>} : memref<128x128xbf16, #tpu.memory_space<vmem>>, vector<128x128xbf16>,
    return
  }
  func.func @transform_0(%arg0: i32) -> (i32, i32) {
    %c0_i32 = arith.constant 0 : i32
    %c0_i32_0 = arith.constant 0 : i32
    return %arg0, %c0_i32 : i32, i32
  }
  func.func @transform_1(%arg0: i32) -> (i32, i32) {
    %c0_i32 = arith.constant 0 : i32
    %c0_i32_0 = arith.constant 0 : i32
    %c0_i32_1 = arith.constant 0 : i32
    return %c0_i32, %c0_i32_0 : i32, i32
  }
  func.func @transform_2(%arg0: i32) -> (i32, i32) {
    %c0_i32 = arith.constant 0 : i32
    %c0_i32_0 = arith.constant 0 : i32
    %c0_i32_1 = arith.constant 0 : i32
    return %c0_i32, %c0_i32_0 : i32, i32
  }
  func.func @transform_3(%arg0: i32) -> (i32, i32) {
    %c0_i32 = arith.constant 0 : i32
    %c0_i32_0 = arith.constant 0 : i32
    %c0_i32_1 = arith.constant 0 : i32
    return %c0_i32, %c0_i32_0 : i32, i32
  }
  func.func @transform_4(%arg0: i32) -> (i32, i32) {
    %c0_i32 = arith.constant 0 : i32
    %c0_i32_0 = arith.constant 0 : i32
    %c0_i32_1 = arith.constant 0 : i32
    return %c0_i32, %c0_i32_0 : i32, i32
  }
  func.func @transform_5(%arg0: i32) -> (i32, i32) {
    %c0_i32 = arith.constant 0 : i32
    %c0_i32_0 = arith.constant 0 : i32
    return %arg0, %c0_i32 : i32, i32
  }
  func.func @transform_6(%arg0: i32) -> (i32, i32) {
    %c0_i32 = arith.constant 0 : i32
    %c0_i32_0 = arith.constant 0 : i32
    return %arg0, %c0_i32 : i32, i32
  }
}

module attributes {stable_mosaic.version = 11 : i64} {
  func.func @_adj_matmul_kernel(%arg0: i32, %arg1: i32, %arg2: memref<128x256xi8, #tpu.memory_space<vmem>>, %arg3: memref<256x128xbf16, #tpu.memory_space<vmem>>, %arg4: memref<128x128xbf16, #tpu.memory_space<vmem>>, %arg5: memref<128x1xf32, #tpu.memory_space<vmem>>, %arg6: memref<128x128xf32, #tpu.memory_space<vmem>>) attributes {dimension_semantics = [#tpu.dimension_semantics<parallel>, #tpu.dimension_semantics<arbitrary>], iteration_bounds = array<i64: 2, 1>, scalar_prefetch = 0 : i64, scratch_operands = 0 : i64, tpu.core_type = #tpu.core_type<tc>, window_params = [{transform_indices = @transform_0, window_bounds = array<i64: 128, 256>}, {transform_indices = @transform_1, window_bounds = array<i64: 256, 128>}, {transform_indices = @transform_2, window_bounds = array<i64: 128, 128>}, {transform_indices = @transform_3, window_bounds = array<i64: 128, 1>}, {transform_indices = @transform_4, window_bounds = array<i64: 128, 128>}]} {
    %c0_i32 = arith.constant 0 : i32
    %0 = arith.cmpi eq, %arg1, %c0_i32 : i32
    %1 = arith.extui %0 : i1 to i32
    %c0_i32_0 = arith.constant 0 : i32
    %2 = arith.cmpi ne, %1, %c0_i32_0 : i32
    scf.if %2 {
      %cst_10 = arith.constant 0.000000e+00 : f32
      %13 = vector.broadcast %cst_10 : f32 to vector<128x128xf32>
      %c0_11 = arith.constant 0 : index
      %c0_12 = arith.constant 0 : index
      %14 = vector.load %arg6[%c0_11, %c0_12] : memref<128x128xf32, #tpu.memory_space<vmem>>, vector<128x128xf32>
      tpu.vector_store %arg6[%c0_11, %c0_12], %13 {strides = array<i32>} : memref<128x128xf32, #tpu.memory_space<vmem>>, vector<128x128xf32>,
    } else {
    }
    %c0 = arith.constant 0 : index
    %c0_1 = arith.constant 0 : index
    %3 = vector.load %arg2[%c0, %c0_1] : memref<128x256xi8, #tpu.memory_space<vmem>>, vector<128x256xi8>
    %4 = arith.sitofp %3 : vector<128x256xi8> to vector<128x256xbf16>
    %c0_2 = arith.constant 0 : index
    %c0_3 = arith.constant 0 : index
    %5 = vector.load %arg6[%c0_2, %c0_3] : memref<128x128xf32, #tpu.memory_space<vmem>>, vector<128x128xf32>
    %c0_4 = arith.constant 0 : index
    %c0_5 = arith.constant 0 : index
    %6 = vector.load %arg3[%c0_4, %c0_5] : memref<256x128xbf16, #tpu.memory_space<vmem>>, vector<256x128xbf16>
    %cst = arith.constant dense<0.000000e+00> : vector<128x128xf32>
    %7 = tpu.matmul %4, %6, %cst {dimension_numbers = #tpu.dot_dimension_numbers<[1], [0], [0], [1], [0, 0, 1, 1], [], []>} : vector<128x256xbf16>, vector<256x128xbf16>, vector<128x128xf32> -> vector<128x128xf32>
    %8 = arith.addf %5, %7 : vector<128x128xf32>
    %c0_6 = arith.constant 0 : index
    %c0_7 = arith.constant 0 : index
    %9 = vector.load %arg6[%c0_6, %c0_7] : memref<128x128xf32, #tpu.memory_space<vmem>>, vector<128x128xf32>
    tpu.vector_store %arg6[%c0_6, %c0_7], %8 {strides = array<i32>} : memref<128x128xf32, #tpu.memory_space<vmem>>, vector<128x128xf32>,
    %c0_i32_8 = arith.constant 0 : i32
    %10 = arith.cmpi eq, %arg1, %c0_i32_8 : i32
    %11 = arith.extui %10 : i1 to i32
    %c0_i32_9 = arith.constant 0 : i32
    %12 = arith.cmpi ne, %11, %c0_i32_9 : i32
    scf.if %12 {
      %c0_10 = arith.constant 0 : index
      %c0_11 = arith.constant 0 : index
      %13 = vector.load %arg4[%c0_10, %c0_11] : memref<128x128xbf16, #tpu.memory_space<vmem>>, vector<128x128xbf16>
      %14 = arith.extf %13 : vector<128x128xbf16> to vector<128x128xf32>
      %c0_12 = arith.constant 0 : index
      %c0_13 = arith.constant 0 : index
      %15 = vector.load %arg5[%c0_12, %c0_13] : memref<128x1xf32, #tpu.memory_space<vmem>>, vector<128x1xf32>
      %c0_14 = arith.constant 0 : index
      %c0_15 = arith.constant 0 : index
      %16 = vector.load %arg6[%c0_14, %c0_15] : memref<128x128xf32, #tpu.memory_space<vmem>>, vector<128x128xf32>
      %17 = vector.broadcast %15 : vector<128x1xf32> to vector<128x128xf32>
      %18 = arith.mulf %17, %16 : vector<128x128xf32>
      %19 = arith.addf %14, %18 : vector<128x128xf32>
      %20 = tpu.iota {dimensions = array<i32: 1>} : vector<128x128xi32>
      %c8_i32 = arith.constant 8 : i32
      %21 = vector.broadcast %c8_i32 : i32 to vector<128x128xi32>
      %22 = arith.cmpi slt, %20, %21 : vector<128x128xi32>
      %cst_16 = arith.constant 0xFF800000 : f32
      %23 = vector.broadcast %cst_16 : f32 to vector<128x128xf32>
      %24 = arith.select %22, %19, %23 : vector<128x128xi1>, vector<128x128xf32>
      %cst_17 = arith.constant dense<0xFF800000> : vector<128xf32>
      %25 = vector.multi_reduction <maximumf>, %24, %cst_17 [1] : vector<128x128xf32> to vector<128xf32>
      %26 = vector.shape_cast %25 : vector<128xf32> to vector<128x1xf32>
      %27 = vector.broadcast %26 : vector<128x1xf32> to vector<128x128xf32>
      %28 = arith.subf %24, %27 : vector<128x128xf32>
      %29 = math.exp %28 : vector<128x128xf32>
      %30 = vector.broadcast %26 : vector<128x1xf32> to vector<128x128xf32>
      %31 = arith.subf %19, %30 : vector<128x128xf32>
      %cst_18 = arith.constant dense<0.000000e+00> : vector<128xf32>
      %32 = vector.multi_reduction <add>, %29, %cst_18 [1] : vector<128x128xf32> to vector<128xf32>
      %33 = vector.shape_cast %32 : vector<128xf32> to vector<128x1xf32>
      %34 = math.log %33 : vector<128x1xf32>
      %35 = vector.broadcast %34 : vector<128x1xf32> to vector<128x128xf32>
      %36 = arith.subf %31, %35 : vector<128x128xf32>
      %c0_19 = arith.constant 0 : index
      %c0_20 = arith.constant 0 : index
      %37 = vector.load %arg6[%c0_19, %c0_20] : memref<128x128xf32, #tpu.memory_space<vmem>>, vector<128x128xf32>
      tpu.vector_store %arg6[%c0_19, %c0_20], %36 {strides = array<i32>} : memref<128x128xf32, #tpu.memory_space<vmem>>, vector<128x128xf32>,
    } else {
    }
    return
  }
  func.func @transform_0(%arg0: i32, %arg1: i32) -> (i32, i32) {
    %c0_i32 = arith.constant 0 : i32
    return %arg0, %arg1 : i32, i32
  }
  func.func @transform_1(%arg0: i32, %arg1: i32) -> (i32, i32) {
    %c0_i32 = arith.constant 0 : i32
    %c0_i32_0 = arith.constant 0 : i32
    return %arg1, %c0_i32 : i32, i32
  }
  func.func @transform_2(%arg0: i32, %arg1: i32) -> (i32, i32) {
    %c0_i32 = arith.constant 0 : i32
    %c0_i32_0 = arith.constant 0 : i32
    return %arg0, %c0_i32 : i32, i32
  }
  func.func @transform_3(%arg0: i32, %arg1: i32) -> (i32, i32) {
    %c0_i32 = arith.constant 0 : i32
    %c0_i32_0 = arith.constant 0 : i32
    return %arg0, %c0_i32 : i32, i32
  }
  func.func @transform_4(%arg0: i32, %arg1: i32) -> (i32, i32) {
    %c0_i32 = arith.constant 0 : i32
    %c0_i32_0 = arith.constant 0 : i32
    return %arg0, %c0_i32 : i32, i32
  }
}

</mosaic_0001>

<bundles_post_ra>
// kernel: graphsage_forward.6
= control target key start
LH: loop header
LB: loop body
LE: loop exit
PB: predicated region body
PF: predicated region fallthrough
CT: control target
= control target key end

     0   :  { %10 = vsyncpa [#allocation3], 0  ;;  %s1543_s0 = inlined_call_operand.vmem [shape: f32[256,128], index: 0, kind: input, shape index: {}]   ;;  %s1544_s1 = inlined_call_operand.hbm [shape: f32[128,128], index: 1, kind: input, shape index: {}]   ;;  %s1545_s2 = inlined_call_operand.hbm [shape: f32[128,128], index: 2, kind: input, shape index: {}]   ;;  %s1546_s3 = inlined_call_operand.vmem [shape: bf16[256,128], index: 3, kind: output, shape index: {0}]   ;;  %s1547_s4 = inlined_call_operand.vmem [shape: bf16[256,128], index: 4, kind: output, shape index: {1}]  }
   0x1   :  { %11 = vsyncpa [#allocation5], 0  ;;  %s1402_s15 = smov 0  }
   0x2 LB: > { %s855_s16 = sadd.s32 4294967295, %s1371_s15   ;;  %p857_p0 = scmp.ge.s32.totalorder %s1371_s15, 1  ;;  %s1371_s15 = sphi %s1402_s15, %s17_s15  }
   0x3   : > { %p142_p1 = scmp.lt.s32.totalorder %s1371_s15, 3  ;;  %s1373_s17 = smov [#allocation2]  }
   0x4   : > { %s154_s18 = sshll.u32 %s1373_s17, 4  ;;  %p1416_p3 = scmp.eq.s32.totalorder %s855_s16, 0  ;;  %s155_s18 = int_to_ptr.vmem [resolvable:$true] %s154_s18 }
   0x5   : > { %p1410_p2 = pnand %p857_p0, %p142_p1  ;;  %s1374_s21 = smov [#allocation4]  }
   0x6   : > { %s1552_s20 = scalar_select %p1416_p3, 1, 0 }
   0x7   : > { %s1551_s19 = scalar_select %p1410_p2, 1, 0 }
   0x8   : > { %p1278_p4 = pneg %p1410_p2  ;;  %s167_s22 = sshll.u32 %s1374_s21, 4  ;;  %s1428_s22 = int_to_ptr.vmem [resolvable:$true] %s167_s22 }
   0x9   : > { %s1301_s26 = scalar_lea.hbm %s1544_s1, 2048 }
   0xa   : > { %p1424_p5 = pnand %p1416_p3, %p1278_p4  ;;  %p1302_p6 = scmp.ne.s32.totalorder %s1544_s1, %s1301_s26 }
   0xb   : > { %p1308_p10 = scmp.lt.u32.totalorder %s1301_s26, %s1544_s1 }
   0xc   : > { %p1303_p7 = pneg %p1424_p5 }
   0xe   : > { %p1304_p8 = pnand %p1303_p7, %p1302_p6 }
  0x10   : > { %p1305_p9 = pneg %p1304_p8 }
  0x12   : > { %p1310_p11 = pnand %p1308_p10, %p1305_p9 }
  0x14   : > { %1313 = shalt.err (!%p1310_p11)
}
  0x15   : > { %s1314_s5 = scalar_lea.vmem %s155_s18, 2048  ;;  %p1322_p1 = scmp.lt.s32.totalorder %s155_s18, %s155_s18 }
  0x16   : > { %p1315_p12 = scmp.ne.s32.totalorder %s155_s18, %s1314_s5  ;;  %p1323_p4 = scmp.lt.s32.totalorder %s1314_s5, %s1314_s5 }
  0x18   : > { %p1317_p13 = pnand %p1315_p12, %p1303_p7  ;;  %p1324_p3 = por %p1323_p4, %p1322_p1 }
  0x1a   : > { %p1318_p0 = pneg %p1317_p13 }
  0x1c   : > { %p1325_p2 = pnand %p1324_p3, %p1318_p0 }
  0x1e   : > { %1328 = shalt.err (!%p1325_p2)
}
  0x1f   : > { %s1375_s6 = smov 128   ;;  %s1376_s7 = smov 8  }
  0x20   : > { %1281 = dma.hbm_to_vmem [thread:$0]  (!%p1424_p5), %s1544_s1, 2048, %s155_s18, [#allocation3], %s1375_s6, %s1375_s6, %s1376_s7  }
  0x21   : > { %s1329_s12 = scalar_lea.hbm %s1545_s2, 2048 }
  0x22   : > { %p1330_p6 = scmp.ne.s32.totalorder %s1545_s2, %s1329_s12  ;;  %p1336_p8 = scmp.lt.u32.totalorder %s1329_s12, %s1545_s2 }
  0x24   : > { %p1332_p2 = pnand %p1330_p6, %p1303_p7 }
  0x26   : > { %p1333_p3 = pneg %p1332_p2 }
  0x28   : > { %p1338_p9 = pnand %p1336_p8, %p1333_p3 }
  0x2a   : > { %1341 = shalt.err (!%p1338_p9)
}
  0x2b   : > { %s1342_s18 = scalar_lea.vmem %s1428_s22, 2048  ;;  %p1350_p13 = scmp.lt.s32.totalorder %s1428_s22, %s1428_s22 }
  0x2c   : > { %p1343_p10 = scmp.ne.s32.totalorder %s1428_s22, %s1342_s18  ;;  %p1351_p0 = scmp.lt.s32.totalorder %s1342_s18, %s1342_s18 }
  0x2e   : > { %p1345_p11 = pnand %p1343_p10, %p1303_p7  ;;  %p1352_p1 = por %p1351_p0, %p1350_p13 }
  0x30   : > { %p1346_p12 = pneg %p1345_p11 }
  0x32   : > { %p1353_p4 = pnand %p1352_p1, %p1346_p12 }
  0x34   : > { %1356 = shalt.err (!%p1353_p4)
}
  0x35   : > { %1284 = dma.hbm_to_vmem [thread:$0]  (!%p1424_p5), %s1545_s2, 2048, %s1428_s22, [#allocation5], %s1375_s6, %s1375_s6, %s1376_s7  }
  0x36   : > { %p1554_p6 = scmp.ne.s32.totalorder %s1551_s19, 0 }
  0x37   : > { %p1555_p2 = scmp.ne.s32.totalorder (!%p1554_p6), %s1552_s20, 0 }
  0x38   : > { %192 = sbr.rel (%p1554_p6) target bundleno = 346 (0x15a), region = 32 }
  0x3f   : > { %1362 = dma.done.wait (%p1555_p2), [#allocation3], 2048  }
  0x40   : > { %1364 = vsyncadd (%p1555_p2), [#allocation3], 4294965248 }
  0x41   : > { %1366 = dma.done.wait (%p1555_p2), [#allocation5], 2048  }
  0x42   : > { %1368 = vsyncadd (%p1555_p2), [#allocation5], 4294965248  ;;  %s864_s23 = sshll.u32 %s855_s16, 4  ;;  %v261_v0 = vld [vmem:[#allocation2] sm:$0xff]  ;;  %v262_v1 = vld [vmem:[#allocation2 + $0x8] sm:$0xff] }
  0x43   : > { %p228_p7 = scmp.lt.s32.totalorder %s864_s23, 31  ;;  %v502_v2 = vld [vmem:[#allocation4] sm:$0xff]  ;;  %v1206_v3 = vpack.c.bf16 %v262_v1, %v261_v0  ;;  %v503_v4 = vld [vmem:[#allocation4 + $0x8] sm:$0xff]  ;;  %v263_v5 = vld [vmem:[#allocation2 + $0x10] sm:$0xff] }
  0x44   : > { %v264_v6 = vld [vmem:[#allocation2 + $0x18] sm:$0xff]  ;;  %v1238_v7 = vpack.c.bf16 %v503_v4, %v502_v2  ;;  %v504_v9 = vld [vmem:[#allocation4 + $0x10] sm:$0xff]  ;;  %v265_v11 = vld [vmem:[#allocation2 + $0x20] sm:$0xff] }
  0x45   : > { %s1557_s23 = smov (!%p228_p7, %s864_s23), 31  ;;  %v1210_v8 = vpack.c.bf16 %v264_v6, %v263_v5  ;;  %v505_v10 = vld [vmem:[#allocation4 + $0x18] sm:$0xff]  ;;  %1207 = vmatprep.subr.bf16.mxu0 %v1206_v3  ;;  %v266_v13 = vld [vmem:[#allocation2 + $0x28] sm:$0xff]  ;;  %v506_v14 = vld [vmem:[#allocation4 + $0x20] sm:$0xff] }
  0x46   : > { %v1242_v12 = vpack.c.bf16 %v505_v10, %v504_v9  ;;  %v507_v15 = vld [vmem:[#allocation4 + $0x28] sm:$0xff]  ;;  %1239 = vmatprep.subr.bf16.mxu1 %v1238_v7  ;;  %1209 = vmatpush3.bf16.msra.mxu0 %v1206_v3  ;;  %s865_s16 = sshll.u32 %s1557_s23, 3  ;;  %v1214_v16 = vpack.c.bf16 %v266_v13, %v265_v11  ;;  %v267_v18 = vld [vmem:[#allocation2 + $0x30] sm:$0xff]  ;;  %v268_v19 = vld [vmem:[#allocation2 + $0x38] sm:$0xff]  ;;  %s867_s26 = sshll.u32 %s1557_s23, 2 }
  0x47   : > { %1241 = vmatpush3.bf16.msra.mxu1 %v1238_v7  ;;  %1211 = vmatprep.subr.bf16.mxu0 %v1210_v8  ;;  %v1246_v17 = vpack.c.bf16 %v507_v15, %v506_v14  ;;  %v508_v20 = vld [vmem:[#allocation4 + $0x30] sm:$0xff]  ;;  %v509_v21 = vld [vmem:[#allocation4 + $0x38] sm:$0xff]  ;;  %s1495_s22 = scalar_lea.vmem %s1543_s0, %s865_s16  ;;  %v1218_v22 = vpack.c.bf16 %v268_v19, %v267_v18  ;;  %v269_v24 = vld [vmem:[#allocation2 + $0x40] sm:$0xff]  ;;  %s1517_s29 = scalar_lea.vmem %s1546_s3, %s867_s26 }
  0x48   : > { %1243 = vmatprep.subr.bf16.mxu1 %v1242_v12  ;;  %v1250_v23 = vpack.c.bf16 %v509_v21, %v508_v20  ;;  %v270_v25 = vld [vmem:[#allocation2 + $0x48] sm:$0xff]  ;;  %v245_v26 = vld [vmem:[%s1495_s22] sm:$0xff]  ;;  %v271_v31 = vld [vmem:[#allocation2 + $0x50] sm:$0xff]  ;;  %s1522_s6 = scalar_lea.vmem %s1547_s4, %s867_s26 }
  0x49   : > { %v510_v27 = vld [vmem:[#allocation4 + $0x40] sm:$0xff]  ;;  %v511_v28 = vld [vmem:[#allocation4 + $0x48] sm:$0xff]  ;;  %1126 = vmatprep.mubr.f32.mxu0 %v245_v26  ;;  %1182 = vmatprep.mubr.f32.mxu1 %v245_v26  ;;  %v1222_v29 = vpack.c.bf16 %v270_v25, %v269_v24  ;;  %v272_v32 = vld [vmem:[#allocation2 + $0x58] sm:$0xff] }
  0x4a   : > { %1213 = vmatpush3.bf16.msra.mxu0 %v1210_v8  ;;  %v1254_v30 = vpack.c.bf16 %v511_v28, %v510_v27  ;;  %v512_v33 = vld [vmem:[#allocation4 + $0x50] sm:$0xff]  ;;  %v513_v34 = vld [vmem:[#allocation4 + $0x58] sm:$0xff]  ;;  %v1226_v35 = vpack.c.bf16 %v272_v32, %v271_v31  ;;  %v273_v37 = vld [vmem:[#allocation2 + $0x60] sm:$0xff] }
  0x4b   : > { %1245 = vmatpush3.bf16.msra.mxu1 %v1242_v12  ;;  %1215 = vmatprep.subr.bf16.mxu0 %v1214_v16  ;;  %v1258_v36 = vpack.c.bf16 %v513_v34, %v512_v33  ;;  %v274_v38 = vld [vmem:[#allocation2 + $0x68] sm:$0xff]  ;;  %v514_v39 = vld [vmem:[#allocation4 + $0x60] sm:$0xff]  ;;  %v275_v43 = vld [vmem:[#allocation2 + $0x70] sm:$0xff] }
  0x4c   : > { %1247 = vmatprep.subr.bf16.mxu1 %v1246_v17  ;;  %v515_v40 = vld [vmem:[#allocation4 + $0x68] sm:$0xff]  ;;  %v1230_v41 = vpack.c.bf16 %v274_v38, %v273_v37  ;;  %v276_v44 = vld [vmem:[#allocation2 + $0x78] sm:$0xff]  ;;  %v516_v45 = vld [vmem:[#allocation4 + $0x70] sm:$0xff] }
  0x4d   : > { %v1262_v42 = vpack.c.bf16 %v515_v40, %v514_v39  ;;  %v517_v46 = vld [vmem:[#allocation4 + $0x78] sm:$0xff]  ;;  %v1234_v47 = vpack.c.bf16 %v276_v44, %v275_v43  ;;  %v246_v49 = vld [vmem:[%s1495_s22 + $0x8] sm:$0xff]  ;;  %v247_v50 = vld [vmem:[%s1495_s22 + $0x10] sm:$0xff] }
  0x4e   : > { %1217 = vmatpush3.bf16.msra.mxu0 %v1214_v16  ;;  %v1266_v48 = vpack.c.bf16 %v517_v46, %v516_v45  ;;  %v248_v51 = vld [vmem:[%s1495_s22 + $0x18] sm:$0xff]  ;;  %v249_v52 = vld [vmem:[%s1495_s22 + $0x20] sm:$0xff]  ;;  %v250_v53 = vld [vmem:[%s1495_s22 + $0x28] sm:$0xff] }
  0x4f   : > { %1249 = vmatpush3.bf16.msra.mxu1 %v1246_v17  ;;  %1219 = vmatprep.subr.bf16.mxu0 %v1218_v22  ;;  %v251_v54 = vld [vmem:[%s1495_s22 + $0x30] sm:$0xff]  ;;  %v252_v55 = vld [vmem:[%s1495_s22 + $0x38] sm:$0xff]  ;;  %v253_v56 = vld [vmem:[%s1495_s22 + $0x40] sm:$0xff] }
  0x50   : > { %1251 = vmatprep.subr.bf16.mxu1 %v1250_v23  ;;  %v254_v57 = vld [vmem:[%s1495_s22 + $0x48] sm:$0xff]  ;;  %v255_v58 = vld [vmem:[%s1495_s22 + $0x50] sm:$0xff]  ;;  %v256_v59 = vld [vmem:[%s1495_s22 + $0x58] sm:$0xff] }
  0x51   : > { %v257_v60 = vld [vmem:[%s1495_s22 + $0x60] sm:$0xff]  ;;  %v258_v61 = vld [vmem:[%s1495_s22 + $0x68] sm:$0xff]  ;;  %v259_v62 = vld [vmem:[%s1495_s22 + $0x70] sm:$0xff] }
  0x52   : > { %1221 = vmatpush3.bf16.msra.mxu0 %v1218_v22  ;;  %v260_v63 = vld [vmem:[%s1495_s22 + $0x78] sm:$0xff] }
  0x53   : > { %1253 = vmatpush3.bf16.msra.mxu1 %v1250_v23  ;;  %1223 = vmatprep.subr.bf16.mxu0 %v1222_v29 }
  0x54   : > { %1255 = vmatprep.subr.bf16.mxu1 %v1254_v30 }
  0x56   : > { %1225 = vmatpush3.bf16.msra.mxu0 %v1222_v29 }
  0x57   : > { %1257 = vmatpush3.bf16.msra.mxu1 %v1254_v30  ;;  %1227 = vmatprep.subr.bf16.mxu0 %v1226_v35 }
  0x58   : > { %1259 = vmatprep.subr.bf16.mxu1 %v1258_v36 }
  0x5a   : > { %1229 = vmatpush3.bf16.msra.mxu0 %v1226_v35 }
  0x5b   : > { %1261 = vmatpush3.bf16.msra.mxu1 %v1258_v36  ;;  %1231 = vmatprep.subr.bf16.mxu0 %v1230_v41 }
  0x5c   : > { %1263 = vmatprep.subr.bf16.mxu1 %v1262_v42 }
  0x5e   : > { %1233 = vmatpush3.bf16.msra.mxu0 %v1230_v41 }
  0x5f   : > { %1265 = vmatpush3.bf16.msra.mxu1 %v1262_v42  ;;  %1235 = vmatprep.subr.bf16.mxu0 %v1234_v47 }
  0x60   : > { %1267 = vmatprep.subr.bf16.mxu1 %v1266_v48 }
  0x62   : > { %1237 = vmatpush3.bf16.msra.mxu0 %v1234_v47 }
  0x63   : > { %1269 = vmatpush3.bf16.msra.mxu1 %v1266_v48 }
  0x65   : > { %1127 = vmatmul.mubr.f32.vlgmr.msra.gmra.mrb[0].mxu0 %v246_v49 }
  0x66   : > { %1183 = vmatmul.mubr.f32.vlgmr.msra.gmra.mrb[0].mxu1 %v246_v49  ;;  %1129 = vmatprep.mubr.f32.mxu0 %v247_v50 }
  0x67   : > { %1185 = vmatprep.mubr.f32.mxu1 %v247_v50 }
  0x69   : > { %1130 = vmatmul.mubr.f32.gmra.mrb[2].mxu0 %v248_v51 }
  0x6a   : > { %1186 = vmatmul.mubr.f32.gmra.mrb[2].mxu1 %v248_v51  ;;  %1132 = vmatprep.mubr.f32.mxu0 %v249_v52 }
  0x6b   : > { %1188 = vmatprep.mubr.f32.mxu1 %v249_v52 }
  0x6d   : > { %1133 = vmatmul.mubr.f32.gmra.mrb[4].mxu0 %v250_v53 }
  0x6e   : > { %1189 = vmatmul.mubr.f32.gmra.mrb[4].mxu1 %v250_v53  ;;  %1135 = vmatprep.mubr.f32.mxu0 %v251_v54 }
  0x6f   : > { %1191 = vmatprep.mubr.f32.mxu1 %v251_v54 }
  0x71   : > { %1136 = vmatmul.mubr.f32.gmra.mrb[6].mxu0 %v252_v55 }
  0x72   : > { %1192 = vmatmul.mubr.f32.gmra.mrb[6].mxu1 %v252_v55  ;;  %1138 = vmatprep.mubr.f32.mxu0 %v253_v56 }
  0x73   : > { %1194 = vmatprep.mubr.f32.mxu1 %v253_v56 }
  0x75   : > { %1139 = vmatmul.mubr.f32.gmra.mrb[8].mxu0 %v254_v57 }
  0x76   : > { %1195 = vmatmul.mubr.f32.gmra.mrb[8].mxu1 %v254_v57  ;;  %1141 = vmatprep.mubr.f32.mxu0 %v255_v58 }
  0x77   : > { %1197 = vmatprep.mubr.f32.mxu1 %v255_v58 }
  0x79   : > { %1142 = vmatmul.mubr.f32.gmra.mrb[10].mxu0 %v256_v59 }
  0x7a   : > { %1198 = vmatmul.mubr.f32.gmra.mrb[10].mxu1 %v256_v59  ;;  %1144 = vmatprep.mubr.f32.mxu0 %v257_v60 }
  0x7b   : > { %1200 = vmatprep.mubr.f32.mxu1 %v257_v60 }
  0x7d   : > { %1145 = vmatmul.mubr.f32.gmra.mrb[12].mxu0 %v258_v61 }
  0x7e   : > { %1201 = vmatmul.mubr.f32.gmra.mrb[12].mxu1 %v258_v61  ;;  %1147 = vmatprep.mubr.f32.mxu0 %v259_v62 }
  0x7f   : > { %1203 = vmatprep.mubr.f32.mxu1 %v259_v62 }
  0x81   : > { %1148 = vmatmul.mubr.f32.gmra.mrb[14].mxu0 %v260_v63 }
  0x82   : > { %1204 = vmatmul.mubr.f32.gmra.mrb[14].mxu1 %v260_v63 }
 0x138   : > { %v1128_v0 = vpop.f32.mrb[0].mxu0 }
 0x139   : > { %v1184_v1 = vpop.f32.mrb[0].mxu1  ;;  %v343_v2 = vpop.f32.mrb[1].mxu0 }
 0x13a   : > { %v939_v3 = vpack.c.bf16 %v1128_v0, %v343_v2  ;;  %v584_v4 = vpop.f32.mrb[1].mxu1 }
 0x13b   : > { %v979_v5 = vpack.c.bf16 %v1184_v1, %v584_v4 }
 0x13c   : > { %940 = vst [vmem:[%s1517_s29] sm:$0xff] %v939_v3   ;;  %v1131_v6 = vpop.f32.mrb[2].mxu0 }
 0x13d   : > { %980 = vst [vmem:[%s1522_s6] sm:$0xff] %v979_v5   ;;  %v1187_v7 = vpop.f32.mrb[2].mxu1  ;;  %v353_v8 = vpop.f32.mrb[3].mxu0 }
 0x13e   : > { %v944_v9 = vpack.c.bf16 %v1131_v6, %v353_v8  ;;  %v594_v10 = vpop.f32.mrb[3].mxu1 }
 0x13f   : > { %v984_v11 = vpack.c.bf16 %v1187_v7, %v594_v10 }
 0x140   : > { %1016 = vst [vmem:[%s1517_s29 + $0x8] sm:$0xff] %v944_v9   ;;  %v1134_v12 = vpop.f32.mrb[4].mxu0 }
 0x141   : > { %1023 = vst [vmem:[%s1522_s6 + $0x8] sm:$0xff] %v984_v11   ;;  %v1190_v13 = vpop.f32.mrb[4].mxu1  ;;  %v363_v14 = vpop.f32.mrb[5].mxu0 }
 0x142   : > { %v949_v15 = vpack.c.bf16 %v1134_v12, %v363_v14  ;;  %v604_v16 = vpop.f32.mrb[5].mxu1 }
 0x143   : > { %v989_v17 = vpack.c.bf16 %v1190_v13, %v604_v16 }
 0x144   : > { %1017 = vst [vmem:[%s1517_s29 + $0x10] sm:$0xff] %v949_v15   ;;  %v1137_v18 = vpop.f32.mrb[6].mxu0 }
 0x145   : > { %1024 = vst [vmem:[%s1522_s6 + $0x10] sm:$0xff] %v989_v17   ;;  %v1193_v19 = vpop.f32.mrb[6].mxu1  ;;  %v373_v20 = vpop.f32.mrb[7].mxu0 }
 0x146   : > { %v954_v21 = vpack.c.bf16 %v1137_v18, %v373_v20  ;;  %v614_v22 = vpop.f32.mrb[7].mxu1 }
 0x147   : > { %v994_v23 = vpack.c.bf16 %v1193_v19, %v614_v22 }
 0x148   : > { %1018 = vst [vmem:[%s1517_s29 + $0x18] sm:$0xff] %v954_v21   ;;  %v1140_v24 = vpop.f32.mrb[8].mxu0 }
 0x149   : > { %1025 = vst [vmem:[%s1522_s6 + $0x18] sm:$0xff] %v994_v23   ;;  %v1196_v25 = vpop.f32.mrb[8].mxu1  ;;  %v383_v26 = vpop.f32.mrb[9].mxu0 }
 0x14a   : > { %v959_v27 = vpack.c.bf16 %v1140_v24, %v383_v26  ;;  %v624_v28 = vpop.f32.mrb[9].mxu1 }
 0x14b   : > { %v999_v29 = vpack.c.bf16 %v1196_v25, %v624_v28 }
 0x14c   : > { %1019 = vst [vmem:[%s1517_s29 + $0x20] sm:$0xff] %v959_v27   ;;  %v1143_v30 = vpop.f32.mrb[10].mxu0 }
 0x14d   : > { %1026 = vst [vmem:[%s1522_s6 + $0x20] sm:$0xff] %v999_v29   ;;  %v1199_v31 = vpop.f32.mrb[10].mxu1  ;;  %v393_v32 = vpop.f32.mrb[11].mxu0 }
 0x14e   : > { %v964_v33 = vpack.c.bf16 %v1143_v30, %v393_v32  ;;  %v634_v34 = vpop.f32.mrb[11].mxu1 }
 0x14f   : > { %v1004_v35 = vpack.c.bf16 %v1199_v31, %v634_v34 }
 0x150   : > { %1020 = vst [vmem:[%s1517_s29 + $0x28] sm:$0xff] %v964_v33   ;;  %v1146_v36 = vpop.f32.mrb[12].mxu0 }
 0x151   : > { %1027 = vst [vmem:[%s1522_s6 + $0x28] sm:$0xff] %v1004_v35   ;;  %v1202_v37 = vpop.f32.mrb[12].mxu1  ;;  %v403_v38 = vpop.f32.mrb[13].mxu0 }
 0x152   : > { %v969_v39 = vpack.c.bf16 %v1146_v36, %v403_v38  ;;  %v644_v40 = vpop.f32.mrb[13].mxu1 }
 0x153   : > { %v1009_v41 = vpack.c.bf16 %v1202_v37, %v644_v40 }
 0x154   : > { %1021 = vst [vmem:[%s1517_s29 + $0x30] sm:$0xff] %v969_v39   ;;  %v1149_v42 = vpop.f32.mrb[14].mxu0 }
 0x155   : > { %1028 = vst [vmem:[%s1522_s6 + $0x30] sm:$0xff] %v1009_v41   ;;  %v1205_v43 = vpop.f32.mrb[14].mxu1  ;;  %v413_v44 = vpop.f32.mrb[15].mxu0 }
 0x156   : > { %v974_v45 = vpack.c.bf16 %v1149_v42, %v413_v44  ;;  %v654_v46 = vpop.f32.mrb[15].mxu1 }
 0x157   : > { %v1014_v47 = vpack.c.bf16 %v1205_v43, %v654_v46 }
 0x158   : > { %1022 = vst [vmem:[%s1517_s29 + $0x38] sm:$0xff] %v974_v45  }
 0x159   : > { %1029 = vst [vmem:[%s1522_s6 + $0x38] sm:$0xff] %v1014_v47  }
 0x15a PF: > { %s17_s15 = sadd.s32 1, %s1371_s15  }
 0x15b   : > { %p14_p5 = scmp.ge.s32.totalorder %s17_s15, 4  }
 0x15d   :  { %16 = sbr.rel (!%p14_p5) target bundleno = 2 (0x2), region = 83 }
 0x164   :  { %782 = vsyncpa [#allocation3], 1 }
 0x165   :  { %784 = vsyncpa [#allocation3 + $0x1], 1 }
 0x166   :  { %785 = vsyncpa [#allocation5], 1 }

// kernel: graphsage_forward.7
= control target key start
LH: loop header
LB: loop body
LE: loop exit
PB: predicated region body
PF: predicated region fallthrough
CT: control target
= control target key end

     0   :  { %s1359_s21 = smov 0   ;;  %s1361_s22 = smov 0   ;;  %s1561_s0 = inlined_call_operand.vmem [shape: s8[256,256], index: 0, kind: input, shape index: {}]   ;;  %s1562_s1 = inlined_call_operand.vmem [shape: bf16[256,128], index: 1, kind: input, shape index: {}]   ;;  %s1563_s2 = inlined_call_operand.vmem [shape: bf16[256,128], index: 2, kind: input, shape index: {}]   ;;  %s1564_s3 = inlined_call_operand.vmem [shape: f32[256,1], index: 3, kind: input, shape index: {}]   ;;  %s1565_s4 = inlined_call_operand.vmem [shape: f32[256,128], index: 4, kind: output, shape index: {0}]   ;;  %s1566_s5 = inlined_call_operand.vmem [shape: f32[2,1,128], index: 5, kind: output, shape index: {1}]   ;;  %s1567_s6 = inlined_call_operand.vmem [shape: f32[2,1,128], index: 6, kind: output, shape index: {2}]  }
   0x1   :  { %s1363_s23 = smov 0  }
   0x2 LB: > { %s29_s24 = sadd.s32 1, %s1317_s22  ;;  %p1107_p0 = scmp.ge.s32.totalorder %s1321_s23, 1  ;;  %s1321_s23 = sphi %s1363_s23, %s17_s23   ;;  %s1317_s22 = sphi %s1361_s22, %s1569_s22   ;;  %s1313_s21 = sphi %s1359_s21, %s1568_s21  }
   0x3   : > { %p31_p1 = scmp.ge.s32.totalorder %s29_s24, 2  ;;  %p271_p2 = scmp.lt.s32.totalorder %s1321_s23, 3 }
   0x5   : > { %s1571_s24 = smov (%p31_p1, %s29_s24), 0  ;;  %p272_p3 = pnand %p1107_p0, %p271_p2 }
   0x6   : > { %v1283_v0 = vld [vmem:[%s1562_s1 + $0x40] sm:$0xff] (!%p272_p3)   ;;  %s1108_s27 = sshll.u32 (!%p272_p3), %s1313_s21, 2  ;;  %v1285_v2 = vld [vmem:[%s1562_s1 + $0x48] sm:$0xff] (!%p272_p3)   ;;  %v1287_v4 = vld [vmem:[%s1562_s1 + $0x50] sm:$0xff] (!%p272_p3)   ;;  %s1111_s12 = sshll.u32 (!%p272_p3), %s1313_s21, 4  ;;  %v1323_v5 = vmov (!%p272_p3), 0  }
   0x7   : > { %275 = sbr.rel (%p272_p3) target bundleno = 317 (0x13d), region = 36  ;;  %v1284_v1 = vld [vmem:[%s1562_s1] sm:$0xff] (!%p272_p3)   ;;  %p329_p4 = scmp.lt.s32.totalorder (!%p272_p3), %s1108_s27, 7  ;;  %1175 = vmatprep.subr.bf16.mxu0 (!%p272_p3), %v1283_v0  ;;  %1239 = vmatprep.subr.bf16.mxu1 (!%p272_p3), %v1283_v0  ;;  %v1286_v3 = vld [vmem:[%s1562_s1 + $0x8] sm:$0xff] (!%p272_p3)   ;;  %v1288_v6 = vld [vmem:[%s1562_s1 + $0x10] sm:$0xff] (!%p272_p3)  }
   0x8   : > { %1176 = vmatpush3.bf16.msra.mxu0 (!%p272_p3), %v1284_v1  ;;  %1247 = vmatpush3.bf16.msra.mxu1 (!%p272_p3), %v1284_v1  ;;  %p346_p5 = scmp.lt.s32.totalorder (!%p272_p3), %s1111_s12, 31  ;;  %v1289_v7 = vld [vmem:[%s1562_s1 + $0x58] sm:$0xff] (!%p272_p3)   ;;  %v1291_v9 = vld [vmem:[%s1562_s1 + $0x60] sm:$0xff] (!%p272_p3)   ;;  %v1293_v11 = vld [vmem:[%s1562_s1 + $0x68] sm:$0xff] (!%p272_p3)   ;;  %p363_p6 = scmp.lt.s32.totalorder (!%p272_p3), %s1313_s21, 1 }
   0x9   : > { %1177 = vmatprep.subr.bf16.mxu0 (!%p272_p3), %v1285_v2  ;;  %1240 = vmatprep.subr.bf16.mxu1 (!%p272_p3), %v1285_v2  ;;  %v1290_v8 = vld [vmem:[%s1562_s1 + $0x18] sm:$0xff] (!%p272_p3)   ;;  %v1292_v10 = vld [vmem:[%s1562_s1 + $0x20] sm:$0xff] (!%p272_p3)   ;;  %v1294_v16 = vld [vmem:[%s1562_s1 + $0x28] sm:$0xff] (!%p272_p3)  }
   0xa   : > { %1281 = vset.pattern.permute.xlu0 (!%p272_p3), %v1323_v5  ;;  %1282 = vset.pattern.permute.xlu1 (!%p272_p3), %v1323_v5  ;;  %v1295_v19 = vld [vmem:[%s1562_s1 + $0x70] sm:$0xff] (!%p272_p3)   ;;  %v1297_v23 = vld [vmem:[%s1562_s1 + $0x78] sm:$0xff] (!%p272_p3)  }
   0xb   : > { %v1296_v20 = vld [vmem:[%s1562_s1 + $0x30] sm:$0xff] (!%p272_p3)   ;;  %v1298_v24 = vld [vmem:[%s1562_s1 + $0x38] sm:$0xff] (!%p272_p3)  }
   0xc   : > { %1178 = vmatpush3.bf16.msra.mxu0 (!%p272_p3), %v1286_v3  ;;  %1248 = vmatpush3.bf16.msra.mxu1 (!%p272_p3), %v1286_v3 }
   0xd   : > { %1179 = vmatprep.subr.bf16.mxu0 (!%p272_p3), %v1287_v4  ;;  %1241 = vmatprep.subr.bf16.mxu1 (!%p272_p3), %v1287_v4 }
   0xe   : > { %s1573_s27 = smov (!%p329_p4, %s1108_s27), 7  ;;  %s1575_s12 = smov (!%p346_p5, %s1111_s12), 31 }
   0xf   : > { %s1135_s17 = sshll.u32 %s1573_s27, 4  ;;  %s1114_s27 = sshll.u32 %s1575_s12, 3 }
  0x10   : > { %1180 = vmatpush3.bf16.msra.mxu0 %v1288_v6  ;;  %1249 = vmatpush3.bf16.msra.mxu1 %v1288_v6  ;;  %s1413_s29 = scalar_lea.vmem %s1561_s0, %s1135_s17  ;;  %s1429_s13 = scalar_lea.vmem %s1564_s3, %s1114_s27 }
  0x11   : > { %1181 = vmatprep.subr.bf16.mxu0 %v1289_v7  ;;  %1242 = vmatprep.subr.bf16.mxu1 %v1289_v7  ;;  %v391_v12 = vld [vmem:[%s1413_s29 + $0x8] sm:$0xff]  ;;  %v722_v17 = vld [vmem:[%s1429_s13] sm:$0xff]  ;;  %v724_v18 = vld [vmem:[%s1429_s13 + $0x10] sm:$0xff]  ;;  %s1491_s11 = scalar_lea.vmem %s1565_s4, %s1114_s27  ;;  %s1577_s21 = smov (!%p363_p6, %s1313_s21), 1 }
  0x12   : > { %v395_v13 = vld [vmem:[%s1413_s29 + $0x28] sm:$0xff]  ;;  %v399_v14 = vunpack.c.l.s8.bf16 %v391_v12  ;;  %756 = vperm.xlu0 %1281, %v722_v17   ;;  %766 = vperm.xlu1 %1282, %v724_v18   ;;  %v725_v22 = vld [vmem:[%s1429_s13 + $0x18] sm:$0xff]  ;;  %v390_v25 = vld [vmem:[%s1413_s29] sm:$0xff]  ;;  %v401_v31 = vunpack.c.h.s8.bf16 %v391_v12  ;;  %s368_s16 = scalar_lea.vmem %s1567_s6, %s1577_s21 }
  0x13   : > { %v407_v15 = vunpack.c.l.s8.bf16 %v395_v13  ;;  %v723_v21 = vld [vmem:[%s1429_s13 + $0x8] sm:$0xff]  ;;  %v394_v26 = vld [vmem:[%s1413_s29 + $0x20] sm:$0xff]  ;;  %v398_v29 = vunpack.c.l.s8.bf16 %v390_v25  ;;  %v409_v32 = vunpack.c.h.s8.bf16 %v395_v13  ;;  %v728_v33 = vld [vmem:[%s1429_s13 + $0x30] sm:$0xff]  ;;  %v400_v39 = vunpack.c.h.s8.bf16 %v390_v25 }
  0x14   : > { %1182 = vmatpush3.bf16.msra.mxu0 %v1290_v8  ;;  %1250 = vmatpush3.bf16.msra.mxu1 %v1290_v8  ;;  %v726_v27 = vld [vmem:[%s1429_s13 + $0x20] sm:$0xff]  ;;  %v727_v28 = vld [vmem:[%s1429_s13 + $0x28] sm:$0xff]  ;;  %v406_v30 = vunpack.c.l.s8.bf16 %v394_v26  ;;  %v729_v34 = vld [vmem:[%s1429_s13 + $0x38] sm:$0xff]  ;;  %v408_v40 = vunpack.c.h.s8.bf16 %v394_v26 }
  0x15   : > { %1183 = vmatprep.subr.bf16.mxu0 %v1291_v9  ;;  %1243 = vmatprep.subr.bf16.mxu1 %v1291_v9  ;;  %v393_v35 = vld [vmem:[%s1413_s29 + $0x18] sm:$0xff]  ;;  %v730_v37 = vld [vmem:[%s1429_s13 + $0x40] sm:$0xff]  ;;  %v731_v38 = vld [vmem:[%s1429_s13 + $0x48] sm:$0xff] }
  0x16   : > { %590 = vmatprep.mubr.bf16.mxu0 %v399_v14  ;;  %622 = vmatprep.mubr.bf16.mxu1 %v407_v15  ;;  %v397_v36 = vld [vmem:[%s1413_s29 + $0x38] sm:$0xff]  ;;  %v403_v41 = vunpack.c.l.s8.bf16 %v393_v35  ;;  %v732_v43 = vld [vmem:[%s1429_s13 + $0x50] sm:$0xff]  ;;  %v734_v47 = vld [vmem:[%s1429_s13 + $0x60] sm:$0xff]  ;;  %v405_v51 = vunpack.c.h.s8.bf16 %v393_v35 }
  0x17   : > { %761 = vperm.xlu0 %1281, %v723_v21   ;;  %771 = vperm.xlu1 %1282, %v725_v22   ;;  %v411_v42 = vunpack.c.l.s8.bf16 %v397_v36  ;;  %v733_v44 = vld [vmem:[%s1429_s13 + $0x58] sm:$0xff]  ;;  %v392_v45 = vld [vmem:[%s1413_s29 + $0x10] sm:$0xff]  ;;  %v735_v48 = vld [vmem:[%s1429_s13 + $0x68] sm:$0xff]  ;;  %v413_v52 = vunpack.c.h.s8.bf16 %v397_v36 }
  0x18   : > { %1184 = vmatpush3.bf16.msra.mxu0 %v1292_v10  ;;  %1251 = vmatpush3.bf16.msra.mxu1 %v1292_v10  ;;  %v396_v46 = vld [vmem:[%s1413_s29 + $0x30] sm:$0xff]  ;;  %v402_v49 = vunpack.c.l.s8.bf16 %v392_v45  ;;  %v737_v54 = vld [vmem:[%s1429_s13 + $0x78] sm:$0xff]  ;;  %v404_v55 = vunpack.c.h.s8.bf16 %v392_v45  ;;  %s1112_s29 = sshll.u32 %s1575_s12, 2 }
  0x19   : > { %1185 = vmatprep.subr.bf16.mxu0 %v1293_v11  ;;  %1244 = vmatprep.subr.bf16.mxu1 %v1293_v11  ;;  %v410_v50 = vunpack.c.l.s8.bf16 %v396_v46  ;;  %v736_v53 = vld [vmem:[%s1429_s13 + $0x70] sm:$0xff]  ;;  %v412_v56 = vunpack.c.h.s8.bf16 %v396_v46  ;;  %s1478_s8 = scalar_lea.vmem %s1563_s2, %s1112_s29  ;;  %s365_s13 = scalar_lea.vmem %s1566_s5, %s1577_s21 }
  0x1a   : > { %v1137_v2 = vld [vmem:[%s1478_s8] sm:$0xff]   ;;  %v1168_v26 = vld [vmem:[%s1478_s8 + $0x8] sm:$0xff]  }
  0x1b   : > { %776 = vperm.xlu0 %1281, %v726_v27   ;;  %781 = vperm.xlu1 %1282, %v727_v28   ;;  %v1171_v4 = vld [vmem:[%s1478_s8 + $0x20] sm:$0xff]   ;;  %v1138_v11 = vunpack.c.l.bf16 %v1137_v2  ;;  %v1139_v17 = vunpack.c.h.bf16 %v1137_v2  ;;  %v1172_v36 = vld [vmem:[%s1478_s8 + $0x28] sm:$0xff]  }
  0x1c   : > { %1186 = vmatpush3.bf16.msra.mxu0 %v1294_v16  ;;  %1252 = vmatpush3.bf16.msra.mxu1 %v1294_v16  ;;  %v1154_v14 = vunpack.c.l.bf16 %v1171_v4  ;;  %v1155_v22 = vunpack.c.h.bf16 %v1171_v4  ;;  %v1158_v46 = vunpack.c.l.bf16 %v1172_v36 }
  0x1d   : > { %1187 = vmatprep.subr.bf16.mxu0 %v1295_v19  ;;  %1245 = vmatprep.subr.bf16.mxu1 %v1295_v19 }
  0x1f   : > { %786 = vperm.xlu0 %1281, %v728_v33   ;;  %791 = vperm.xlu1 %1282, %v729_v34  }
  0x20   : > { %1188 = vmatpush3.bf16.msra.mxu0 %v1296_v20  ;;  %1253 = vmatpush3.bf16.msra.mxu1 %v1296_v20 }
  0x21   : > { %1189 = vmatprep.subr.bf16.mxu0 %v1297_v23  ;;  %1246 = vmatprep.subr.bf16.mxu1 %v1297_v23 }
  0x23   : > { %796 = vperm.xlu0 %1281, %v730_v37   ;;  %801 = vperm.xlu1 %1282, %v731_v38   ;;  %v1142_v38 = vunpack.c.l.bf16 %v1168_v26 }
  0x24   : > { %1190 = vmatpush3.bf16.msra.mxu0 %v1298_v24  ;;  %1254 = vmatpush3.bf16.msra.mxu1 %v1298_v24 }
  0x27   : > { %591 = vmatmul.mubr.bf16.vlgmr.msra.gmra.mrb[0].mxu0 %v398_v29  ;;  %623 = vmatmul.mubr.bf16.vlgmr.msra.gmra.mrb[0].mxu1 %v406_v30 }
  0x28   : > { %598 = vmatprep.mubr.bf16.mxu0 %v401_v31  ;;  %630 = vmatprep.mubr.bf16.mxu1 %v409_v32 }
  0x29   : > { %806 = vperm.xlu0 %1281, %v732_v43   ;;  %811 = vperm.xlu1 %1282, %v733_v44  }
  0x2d   : > { %816 = vperm.xlu0 %1281, %v734_v47   ;;  %821 = vperm.xlu1 %1282, %v735_v48  }
  0x2f   : > { %599 = vmatmul.mubr.bf16.gmra.mrb[4].mxu0 %v400_v39  ;;  %631 = vmatmul.mubr.bf16.gmra.mrb[4].mxu1 %v408_v40 }
  0x30   : > { %606 = vmatprep.mubr.bf16.mxu0 %v403_v41  ;;  %638 = vmatprep.mubr.bf16.mxu1 %v411_v42 }
  0x31   : > { %826 = vperm.xlu0 %1281, %v736_v53   ;;  %831 = vperm.xlu1 %1282, %v737_v54   ;;  %v1159_v54 = vunpack.c.h.bf16 %v1172_v36 }
  0x37   : > { %607 = vmatmul.mubr.bf16.gmra.mrb[8].mxu0 %v402_v49  ;;  %639 = vmatmul.mubr.bf16.gmra.mrb[8].mxu1 %v410_v50  ;;  %v1143_v50 = vunpack.c.h.bf16 %v1168_v26 }
  0x38   : > { %614 = vmatprep.mubr.bf16.mxu0 %v405_v51  ;;  %646 = vmatprep.mubr.bf16.mxu1 %v413_v52 }
  0x3f   : > { %615 = vmatmul.mubr.bf16.gmra.mrb[12].mxu0 %v404_v55  ;;  %647 = vmatmul.mubr.bf16.gmra.mrb[12].mxu1 %v412_v56 }
  0x91   : > { %v757_v57 = vpop.permute.xlu0 %756  ;;  %v767_v58 = vpop.permute.xlu1 %766 }
  0x96   : > { %v762_v59 = vpop.permute.xlu0 %761  ;;  %v1468_v60 = vpop.permute.xlu1 %771 }
  0x9a   : > { %v1470_v61 = vpop.permute.xlu0 %776  ;;  %v1472_v62 = vpop.permute.xlu1 %781 }
  0x9e   : > { %v1480_v63 = vpop.permute.xlu0 %786  ;;  %v1482_v0 = vpop.permute.xlu1 %791 }
  0xa2   : > { %v797_v18 = vpop.permute.xlu0 %796  ;;  %v802_v21 = vpop.permute.xlu1 %801 }
  0xa8   : > { %v807_v51 = vpop.permute.xlu0 %806  ;;  %v812_v53 = vpop.permute.xlu1 %811 }
  0xfa   : > { %v1191_v1 = vpop.f32.mrb[0].mxu0  ;;  %v1215_v3 = vpop.f32.mrb[0].mxu1 }
  0xfb   : > { %v1192_v5 = vpop.f32.mrb[1].mxu0  ;;  %v1216_v6 = vpop.f32.mrb[1].mxu1 }
  0xfc   : > { %v1193_v7 = vadd.f32 %v1192_v5, %v1191_v1  ;;  %v1194_v8 = vpop.f32.mrb[2].mxu0  ;;  %v1217_v9 = vadd.f32 %v1216_v6, %v1215_v3  ;;  %v1218_v10 = vpop.f32.mrb[2].mxu1  ;;  %v1169_v1 = vld [vmem:[%s1478_s8 + $0x10] sm:$0xff]  }
  0xfd   : > { %v1195_v12 = vpop.f32.mrb[3].mxu0  ;;  %v1219_v13 = vpop.f32.mrb[3].mxu1 }
  0xfe   : > { %v1196_v15 = vadd.f32 %v1195_v12, %v1194_v8  ;;  %v1220_v16 = vadd.f32 %v1219_v13, %v1218_v10  ;;  %v834_v19 = vmul.f32 %v1193_v7, %v757_v57  ;;  %v842_v20 = vmul.f32 %v1217_v9, %v797_v18 }
 0x100   : > { %v850_v23 = vadd.f32 %v1138_v11, %v834_v19  ;;  %v835_v24 = vmul.f32 %v1196_v15, %v762_v59  ;;  %v1494_v28 = vadd.f32 %v1154_v14, %v842_v20  ;;  %v843_v29 = vmul.f32 %v1220_v16, %v802_v21  ;;  %v1173_v11 = vld [vmem:[%s1478_s8 + $0x30] sm:$0xff]  }
 0x101   : > { %v1162_v19 = vunpack.c.l.bf16 %v1173_v11 }
 0x102   : > { %v1197_v25 = vpop.f32.mrb[4].mxu0  ;;  %v1221_v27 = vpop.f32.mrb[4].mxu1  ;;  %866 = vst [vmem:[%s1491_s11] sm:$0xff] %v850_v23  ;;  %v851_v32 = vadd.f32 %v1139_v17, %v835_v24  ;;  %874 = vst [vmem:[%s1491_s11 + $0x40] sm:$0xff] %v1494_v28  ;;  %v904_v37 = vmul.f32 %v850_v23, %v850_v23  ;;  %v1500_v41 = vadd.f32 %v1155_v22, %v843_v29  ;;  %v1163_v29 = vunpack.c.h.bf16 %v1173_v11 }
 0x103   : > { %v1198_v30 = vpop.f32.mrb[5].mxu0  ;;  %v1222_v31 = vpop.f32.mrb[5].mxu1 }
 0x104   : > { %v1199_v33 = vadd.f32 %v1198_v30, %v1197_v25  ;;  %v1200_v34 = vpop.f32.mrb[6].mxu0  ;;  %v1224_v35 = vpop.f32.mrb[6].mxu1  ;;  %v1223_v40 = vadd.f32 %v1222_v31, %v1221_v27  ;;  %867 = vst [vmem:[%s1491_s11 + $0x8] sm:$0xff] %v851_v32  ;;  %v882_v43 = vadd.f32 %v851_v32, %v850_v23  ;;  %v905_v44 = vmul.f32 %v851_v32, %v851_v32 }
 0x105   : > { %v1201_v39 = vpop.f32.mrb[7].mxu0  ;;  %v1225_v42 = vpop.f32.mrb[7].mxu1  ;;  %875 = vst [vmem:[%s1491_s11 + $0x48] sm:$0xff] %v1500_v41  ;;  %v1147_v25 = vunpack.c.h.bf16 %v1169_v1 }
 0x106   : > { %v1202_v45 = vadd.f32 %v1201_v39, %v1200_v34  ;;  %v1226_v47 = vadd.f32 %v1225_v42, %v1224_v35  ;;  %v920_v48 = vadd.f32 %v905_v44, %v904_v37  ;;  %v836_v49 = vmul.f32 %v1199_v33, %v767_v58  ;;  %v817_v24 = vpop.permute.xlu0 %816  ;;  %v822_v27 = vpop.permute.xlu1 %821  ;;  %v1170_v33 = vld [vmem:[%s1478_s8 + $0x18] sm:$0xff]  }
 0x107   : > { %v844_v52 = vmul.f32 %v1223_v40, %v807_v51  ;;  %v1174_v34 = vld [vmem:[%s1478_s8 + $0x38] sm:$0xff]  }
 0x108   : > { %v852_v55 = vadd.f32 %v1142_v38, %v836_v49  ;;  %v837_v56 = vmul.f32 %v1202_v45, %v1468_v60  ;;  %v845_v5 = vmul.f32 %v1226_v47, %v812_v53  ;;  %v1146_v60 = vunpack.c.l.bf16 %v1169_v1 }
 0x109   : > { %v1507_v2 = vadd.f32 %v1158_v46, %v844_v52  ;;  %v1166_v49 = vunpack.c.l.bf16 %v1174_v34  ;;  %v1151_v1 = vunpack.c.h.bf16 %v1170_v33 }
 0x10a   : > { %v1203_v57 = vpop.f32.mrb[8].mxu0  ;;  %v1227_v59 = vpop.f32.mrb[8].mxu1  ;;  %868 = vst [vmem:[%s1491_s11 + $0x10] sm:$0xff] %v852_v55  ;;  %v883_v58 = vadd.f32 %v882_v43, %v852_v55  ;;  %v906_v6 = vmul.f32 %v852_v55, %v852_v55  ;;  %v853_v7 = vadd.f32 %v1143_v50, %v837_v56  ;;  %v1513_v13 = vadd.f32 %v1159_v54, %v845_v5 }
 0x10b   : > { %v1204_v3 = vpop.f32.mrb[9].mxu0  ;;  %v1228_v4 = vpop.f32.mrb[9].mxu1  ;;  %876 = vst [vmem:[%s1491_s11 + $0x50] sm:$0xff] %v1507_v2 }
 0x10c   : > { %v1205_v8 = vadd.f32 %v1204_v3, %v1203_v57  ;;  %v1206_v9 = vpop.f32.mrb[10].mxu0  ;;  %v1230_v10 = vpop.f32.mrb[10].mxu1  ;;  %v1229_v12 = vadd.f32 %v1228_v4, %v1227_v59  ;;  %v921_v16 = vadd.f32 %v920_v48, %v906_v6  ;;  %869 = vst [vmem:[%s1491_s11 + $0x18] sm:$0xff] %v853_v7  ;;  %v884_v17 = vadd.f32 %v883_v58, %v853_v7 }
 0x10d   : > { %v1207_v14 = vpop.f32.mrb[11].mxu0  ;;  %v1231_v15 = vpop.f32.mrb[11].mxu1  ;;  %v907_v18 = vmul.f32 %v853_v7, %v853_v7  ;;  %877 = vst [vmem:[%s1491_s11 + $0x58] sm:$0xff] %v1513_v13  ;;  %v1150_v48 = vunpack.c.l.bf16 %v1170_v33  ;;  %v1167_v4 = vunpack.c.h.bf16 %v1174_v34 }
 0x10e   : > { %v1208_v20 = vadd.f32 %v1207_v14, %v1206_v9  ;;  %v1232_v21 = vadd.f32 %v1231_v15, %v1230_v10  ;;  %v838_v23 = vmul.f32 %v1205_v8, %v1470_v61  ;;  %v846_v26 = vmul.f32 %v1229_v12, %v817_v24  ;;  %v827_v55 = vpop.permute.xlu0 %826  ;;  %v832_v6 = vpop.permute.xlu1 %831 }
 0x10f   : > { %v922_v22 = vadd.f32 %v921_v16, %v907_v18  ;;  %v912_v15 = vmul.f32 %v1494_v28, %v1494_v28 }
 0x110   : > { %v854_v30 = vadd.f32 %v1146_v60, %v838_v23  ;;  %v862_v35 = vadd.f32 %v1162_v19, %v846_v26  ;;  %v839_v36 = vmul.f32 %v1208_v20, %v1472_v62  ;;  %v847_v37 = vmul.f32 %v1232_v21, %v822_v27 }
 0x111   : > { %v914_v20 = vmul.f32 %v1507_v2, %v1507_v2  ;;  %v915_v23 = vmul.f32 %v1513_v13, %v1513_v13 }
 0x112   : > { %v1209_v31 = vpop.f32.mrb[12].mxu0  ;;  %v1233_v32 = vpop.f32.mrb[12].mxu1  ;;  %870 = vst [vmem:[%s1491_s11 + $0x20] sm:$0xff] %v854_v30  ;;  %v885_v61 = vadd.f32 %v884_v17, %v854_v30  ;;  %v908_v40 = vmul.f32 %v854_v30, %v854_v30  ;;  %878 = vst [vmem:[%s1491_s11 + $0x60] sm:$0xff] %v862_v35  ;;  %v855_v46 = vadd.f32 %v1147_v25, %v839_v36 }
 0x113   : > { %v1210_v38 = vpop.f32.mrb[13].mxu0  ;;  %v1234_v39 = vpop.f32.mrb[13].mxu1  ;;  %v863_v47 = vadd.f32 %v1163_v29, %v847_v37  ;;  %v916_v25 = vmul.f32 %v862_v35, %v862_v35 }
 0x114   : > { %v1211_v42 = vadd.f32 %v1210_v38, %v1209_v31  ;;  %v1235_v43 = vadd.f32 %v1234_v39, %v1233_v32  ;;  %v1212_v44 = vpop.f32.mrb[14].mxu0  ;;  %v1236_v45 = vpop.f32.mrb[14].mxu1  ;;  %v923_v62 = vadd.f32 %v922_v22, %v908_v40  ;;  %871 = vst [vmem:[%s1491_s11 + $0x28] sm:$0xff] %v855_v46  ;;  %v886_v53 = vadd.f32 %v885_v61, %v855_v46 }
 0x115   : > { %v1213_v50 = vpop.f32.mrb[15].mxu0  ;;  %v1237_v51 = vpop.f32.mrb[15].mxu1  ;;  %v909_v54 = vmul.f32 %v855_v46, %v855_v46  ;;  %879 = vst [vmem:[%s1491_s11 + $0x68] sm:$0xff] %v863_v47  ;;  %v917_v29 = vmul.f32 %v863_v47, %v863_v47 }
 0x116   : > { %v1214_v52 = vadd.f32 %v1213_v50, %v1212_v44  ;;  %v1238_v56 = vadd.f32 %v1237_v51, %v1236_v45  ;;  %v840_v57 = vmul.f32 %v1211_v42, %v1480_v63  ;;  %v848_v59 = vmul.f32 %v1235_v43, %v827_v55 }
 0x117   : > { %v924_v3 = vadd.f32 %v923_v62, %v909_v54 }
 0x118   : > { %v856_v5 = vadd.f32 %v1150_v48, %v840_v57  ;;  %v864_v58 = vadd.f32 %v1166_v49, %v848_v59  ;;  %v841_v7 = vmul.f32 %v1214_v52, %v1482_v0  ;;  %v849_v8 = vmul.f32 %v1238_v56, %v832_v6 }
 0x119   : > { %v913_v0 = vmul.f32 %v1500_v41, %v1500_v41 }
 0x11a   : > { %872 = vst [vmem:[%s1491_s11 + $0x30] sm:$0xff] %v856_v5  ;;  %v887_v9 = vadd.f32 %v886_v53, %v856_v5  ;;  %v910_v10 = vmul.f32 %v856_v5, %v856_v5  ;;  %880 = vst [vmem:[%s1491_s11 + $0x70] sm:$0xff] %v864_v58  ;;  %v857_v11 = vadd.f32 %v1151_v1, %v841_v7 }
 0x11b   : > { %v865_v60 = vadd.f32 %v1167_v4, %v849_v8  ;;  %v918_v31 = vmul.f32 %v864_v58, %v864_v58 }
 0x11c   : > { %v925_v12 = vadd.f32 %v924_v3, %v910_v10  ;;  %873 = vst [vmem:[%s1491_s11 + $0x38] sm:$0xff] %v857_v11  ;;  %v888_v63 = vadd.f32 %v887_v9, %v857_v11  ;;  %v911_v14 = vmul.f32 %v857_v11, %v857_v11 }
 0x11d   : > { %881 = vst [vmem:[%s1491_s11 + $0x78] sm:$0xff] %v865_v60 }
 0x11e   : > { %v889_v16 = vadd.f32 %v888_v63, %v1494_v28  ;;  %v926_v17 = vadd.f32 %v925_v12, %v911_v14 }
 0x120   : > { %v890_v18 = vadd.f32 %v889_v16, %v1500_v41  ;;  %v927_v19 = vadd.f32 %v926_v17, %v912_v15 }
 0x122   : > { %v891_v21 = vadd.f32 %v890_v18, %v1507_v2  ;;  %v928_v22 = vadd.f32 %v927_v19, %v913_v0  ;;  %v919_v2 = vmul.f32 %v865_v60, %v865_v60 }
 0x124   : > { %v929_v24 = vadd.f32 %v928_v22, %v914_v20  ;;  %v892_v28 = vadd.f32 %v891_v21, %v1513_v13 }
 0x126   : > { %v893_v26 = vadd.f32 %v892_v28, %v862_v35  ;;  %v930_v27 = vadd.f32 %v929_v24, %v915_v23 }
 0x128   : > { %v894_v41 = vadd.f32 %v893_v26, %v863_v47  ;;  %v931_v30 = vadd.f32 %v930_v27, %v916_v25 }
 0x12a   : > { %v895_v32 = vadd.f32 %v894_v41, %v864_v58  ;;  %v932_v33 = vadd.f32 %v931_v30, %v917_v29 }
 0x12c   : > { %v896_v34 = vadd.f32 %v895_v32, %v865_v60  ;;  %v933_v36 = vadd.f32 %v932_v33, %v918_v31 }
 0x12e   : > { %v897_v37 = vrot.slane %v896_v34, 4  ;;  %v934_v38 = vadd.f32 %v933_v36, %v919_v2 }
 0x130   : > { %v898_v39 = vadd.f32 %v897_v37, %v896_v34  ;;  %v935_v61 = vrot.slane %v934_v38, 4 }
 0x132   : > { %v899_v40 = vrot.slane %v898_v39, 2  ;;  %v936_v13 = vadd.f32 %v935_v61, %v934_v38 }
 0x134   : > { %v900_v35 = vadd.f32 %v899_v40, %v898_v39  ;;  %v937_v42 = vrot.slane %v936_v13, 2 }
 0x136   : > { %v901_v43 = vrot.slane %v900_v35, 1  ;;  %v938_v44 = vadd.f32 %v937_v42, %v936_v13 }
 0x138   : > { %v902_v45 = vadd.f32 %v901_v43, %v900_v35  ;;  %v939_v46 = vrot.slane %v938_v44, 1 }
 0x13a   : > { %903 = vst [vmem:[%s365_s13] sm:$0x1] %v902_v45  ;;  %v940_v47 = vadd.f32 %v939_v46, %v938_v44 }
 0x13c   : > { %941 = vst [vmem:[%s368_s16] sm:$0x1] %v940_v47 }
 0x13d PF: > { %s17_s23 = sadd.s32 1, %s1321_s23   ;;  %s1568_s21 = smov %s1317_s22 }
 0x13e   : > { %p14_p7 = scmp.ge.s32.totalorder %s17_s23, 4   ;;  %s1569_s22 = smov %s1571_s24 }
 0x140   :  { %16 = sbr.rel (!%p14_p7) target bundleno = 2 (0x2), region = 107 }

// kernel: graphsage_forward.8
= control target key start
LH: loop header
LB: loop body
LE: loop exit
PB: predicated region body
PF: predicated region fallthrough
CT: control target
= control target key end

     0   :  { %s1383_s21 = smov 0   ;;  %s1583_s0 = inlined_call_operand.vmem [shape: f32[256,128], index: 0, kind: input, shape index: {}]   ;;  %s1584_s1 = inlined_call_operand.vmem [shape: f32[1,128], index: 1, kind: input, shape index: {}]   ;;  %s1585_s2 = inlined_call_operand.vmem [shape: f32[1,128], index: 2, kind: input, shape index: {}]   ;;  %s1586_s3 = inlined_call_operand.vmem [shape: f32[128,128], index: 3, kind: input, shape index: {}]   ;;  %s1587_s4 = inlined_call_operand.vmem [shape: f32[128,128], index: 4, kind: input, shape index: {}]   ;;  %s1588_s5 = inlined_call_operand.vmem [shape: bf16[256,128], index: 5, kind: output, shape index: {0}]   ;;  %s1589_s6 = inlined_call_operand.vmem [shape: bf16[256,128], index: 6, kind: output, shape index: {1}]  }
   0x1 LB: > { %s919_s22 = sadd.s32 4294967295, %s1346_s21   ;;  %p923_p0 = scmp.ge.s32.totalorder %s1346_s21, 1  ;;  %s1346_s21 = sphi %s1383_s21, %s17_s21  }
   0x2   : > { %p216_p1 = scmp.lt.s32.totalorder %s1346_s21, 3 }
   0x4   : > { %p217_p2 = pnand %p923_p0, %p216_p1 }
   0x5   : > { %v347_v0 = vld [vmem:[%s1586_s3] sm:$0xff] (!%p217_p2)  ;;  %v348_v1 = vld [vmem:[%s1586_s3 + $0x8] sm:$0xff] (!%p217_p2)  ;;  %s924_s29 = sshll.u32 (!%p217_p2), %s919_s22, 4  ;;  %v349_v5 = vld [vmem:[%s1586_s3 + $0x10] sm:$0xff] (!%p217_p2) }
   0x6   : > { %220 = sbr.rel (%p217_p2) target bundleno = 285 (0x11d), region = 40  ;;  %v588_v2 = vld [vmem:[%s1587_s4] sm:$0xff] (!%p217_p2)  ;;  %v1268_v3 = vpack.c.bf16 (!%p217_p2), %v348_v1, %v347_v0  ;;  %v589_v4 = vld [vmem:[%s1587_s4 + $0x8] sm:$0xff] (!%p217_p2)  ;;  %v350_v6 = vld [vmem:[%s1586_s3 + $0x18] sm:$0xff] (!%p217_p2)  ;;  %p252_p3 = scmp.lt.s32.totalorder (!%p217_p2), %s924_s29, 31 }
   0x7   : > { %v1300_v7 = vpack.c.bf16 (!%p217_p2), %v589_v4, %v588_v2  ;;  %v1272_v8 = vpack.c.bf16 (!%p217_p2), %v350_v6, %v349_v5  ;;  %v590_v9 = vld [vmem:[%s1587_s4 + $0x10] sm:$0xff] (!%p217_p2)  ;;  %v591_v10 = vld [vmem:[%s1587_s4 + $0x18] sm:$0xff] (!%p217_p2)  ;;  %v351_v11 = vld [vmem:[%s1586_s3 + $0x20] sm:$0xff] (!%p217_p2) }
   0x8   : > { %1269 = vmatprep.subr.bf16.mxu0 (!%p217_p2), %v1268_v3  ;;  %v1304_v12 = vpack.c.bf16 (!%p217_p2), %v591_v10, %v590_v9  ;;  %v352_v13 = vld [vmem:[%s1586_s3 + $0x28] sm:$0xff] (!%p217_p2)  ;;  %v592_v14 = vld [vmem:[%s1587_s4 + $0x20] sm:$0xff] (!%p217_p2)  ;;  %v353_v18 = vld [vmem:[%s1586_s3 + $0x30] sm:$0xff] (!%p217_p2) }
   0x9   : > { %v593_v15 = vld [vmem:[%s1587_s4 + $0x28] sm:$0xff] (!%p217_p2)  ;;  %1301 = vmatprep.subr.bf16.mxu1 (!%p217_p2), %v1300_v7  ;;  %1271 = vmatpush3.bf16.msra.mxu0 (!%p217_p2), %v1268_v3  ;;  %v1276_v16 = vpack.c.bf16 (!%p217_p2), %v352_v13, %v351_v11  ;;  %v354_v19 = vld [vmem:[%s1586_s3 + $0x38] sm:$0xff] (!%p217_p2)  ;;  %v594_v20 = vld [vmem:[%s1587_s4 + $0x30] sm:$0xff] (!%p217_p2) }
   0xa   : > { %1303 = vmatpush3.bf16.msra.mxu1 (!%p217_p2), %v1300_v7  ;;  %1273 = vmatprep.subr.bf16.mxu0 (!%p217_p2), %v1272_v8  ;;  %v1308_v17 = vpack.c.bf16 (!%p217_p2), %v593_v15, %v592_v14  ;;  %v595_v21 = vld [vmem:[%s1587_s4 + $0x38] sm:$0xff] (!%p217_p2)  ;;  %v1280_v22 = vpack.c.bf16 (!%p217_p2), %v354_v19, %v353_v18  ;;  %v355_v23 = vld [vmem:[%s1586_s3 + $0x40] sm:$0xff] (!%p217_p2)  ;;  %v356_v25 = vld [vmem:[%s1586_s3 + $0x48] sm:$0xff] (!%p217_p2) }
   0xb   : > { %1305 = vmatprep.subr.bf16.mxu1 (!%p217_p2), %v1304_v12  ;;  %v1312_v24 = vpack.c.bf16 (!%p217_p2), %v595_v21, %v594_v20  ;;  %v596_v26 = vld [vmem:[%s1587_s4 + $0x40] sm:$0xff] (!%p217_p2)  ;;  %v597_v28 = vld [vmem:[%s1587_s4 + $0x48] sm:$0xff] (!%p217_p2)  ;;  %v1284_v32 = vpack.c.bf16 (!%p217_p2), %v356_v25, %v355_v23  ;;  %v357_v34 = vld [vmem:[%s1586_s3 + $0x50] sm:$0xff] (!%p217_p2) }
   0xc   : > { %v1463_v29 = vld [vmem:[%s1584_s1] ss:$0 sm:$0xff] (!%p217_p2)  ;;  %v1316_v33 = vpack.c.bf16 (!%p217_p2), %v597_v28, %v596_v26  ;;  %v358_v35 = vld [vmem:[%s1586_s3 + $0x58] sm:$0xff] (!%p217_p2)  ;;  %v598_v37 = vld [vmem:[%s1587_s4 + $0x50] sm:$0xff] (!%p217_p2) }
   0xd   : > { %s1591_s29 = smov (!%p252_p3, %s924_s29), 31  ;;  %1275 = vmatpush3.bf16.msra.mxu0 %v1272_v8  ;;  %v1468_v30 = vld [vmem:[%s1585_s2] ss:$0 sm:$0xff]  ;;  %v599_v38 = vld [vmem:[%s1587_s4 + $0x58] sm:$0xff]  ;;  %v1288_v40 = vpack.c.bf16 %v358_v35, %v357_v34  ;;  %v360_v43 = vld [vmem:[%s1586_s3 + $0x68] sm:$0xff] }
   0xe   : > { %s925_s25 = sshll.u32 %s1591_s29, 3  ;;  %1307 = vmatpush3.bf16.msra.mxu1 %v1304_v12  ;;  %1277 = vmatprep.subr.bf16.mxu0 %v1276_v16  ;;  %v1320_v41 = vpack.c.bf16 %v599_v38, %v598_v37  ;;  %v359_v42 = vld [vmem:[%s1586_s3 + $0x60] sm:$0xff]  ;;  %v601_v45 = vld [vmem:[%s1587_s4 + $0x68] sm:$0xff]  ;;  %v361_v50 = vld [vmem:[%s1586_s3 + $0x70] sm:$0xff] }
   0xf   : > { %s1445_s13 = scalar_lea.vmem %s1583_s0, %s925_s25  ;;  %1309 = vmatprep.subr.bf16.mxu1 %v1308_v17  ;;  %v600_v44 = vld [vmem:[%s1587_s4 + $0x60] sm:$0xff]  ;;  %v1292_v47 = vpack.c.bf16 %v360_v43, %v359_v42  ;;  %v362_v51 = vld [vmem:[%s1586_s3 + $0x78] sm:$0xff]  ;;  %v602_v52 = vld [vmem:[%s1587_s4 + $0x70] sm:$0xff] }
  0x10   : > { %v269_v27 = vld [vmem:[%s1445_s13] sm:$0xff]  ;;  %v270_v46 = vld [vmem:[%s1445_s13 + $0x8] sm:$0xff]  ;;  %v271_v48 = vld [vmem:[%s1445_s13 + $0x10] sm:$0xff]  ;;  %v1324_v49 = vpack.c.bf16 %v601_v45, %v600_v44  ;;  %v1296_v57 = vpack.c.bf16 %v362_v51, %v361_v50 }
  0x11   : > { %1279 = vmatpush3.bf16.msra.mxu0 %v1276_v16  ;;  %v292_v31 = vmul.f32 %v1463_v29, %v269_v27  ;;  %v603_v53 = vld [vmem:[%s1587_s4 + $0x78] sm:$0xff]  ;;  %v293_v54 = vmul.f32 %v1463_v29, %v270_v46  ;;  %v294_v55 = vmul.f32 %v1463_v29, %v271_v48  ;;  %v273_v58 = vld [vmem:[%s1445_s13 + $0x20] sm:$0xff]  ;;  %v274_v0 = vld [vmem:[%s1445_s13 + $0x28] sm:$0xff] }
  0x12   : > { %1311 = vmatpush3.bf16.msra.mxu1 %v1308_v17  ;;  %1281 = vmatprep.subr.bf16.mxu0 %v1280_v22  ;;  %v272_v56 = vld [vmem:[%s1445_s13 + $0x18] sm:$0xff]  ;;  %v1328_v59 = vpack.c.bf16 %v603_v53, %v602_v52  ;;  %v296_v63 = vmul.f32 %v1463_v29, %v273_v58  ;;  %v275_v1 = vld [vmem:[%s1445_s13 + $0x30] sm:$0xff]  ;;  %v297_v4 = vmul.f32 %v1463_v29, %v274_v0  ;;  %v277_v9 = vld [vmem:[%s1445_s13 + $0x40] sm:$0xff] }
  0x13   : > { %1313 = vmatprep.subr.bf16.mxu1 %v1312_v24  ;;  %v315_v36 = vadd.f32 %v1468_v30, %v292_v31  ;;  %v316_v60 = vadd.f32 %v1468_v30, %v293_v54  ;;  %v295_v61 = vmul.f32 %v1463_v29, %v272_v56  ;;  %v317_v62 = vadd.f32 %v1468_v30, %v294_v55  ;;  %v276_v8 = vld [vmem:[%s1445_s13 + $0x38] sm:$0xff]  ;;  %v278_v16 = vld [vmem:[%s1445_s13 + $0x48] sm:$0xff]  ;;  %v279_v17 = vld [vmem:[%s1445_s13 + $0x50] sm:$0xff] }
  0x14   : > { %v319_v6 = vadd.f32 %v1468_v30, %v296_v63  ;;  %v298_v7 = vmul.f32 %v1463_v29, %v275_v1  ;;  %v320_v11 = vadd.f32 %v1468_v30, %v297_v4  ;;  %v299_v12 = vmul.f32 %v1463_v29, %v276_v8  ;;  %v281_v25 = vld [vmem:[%s1445_s13 + $0x60] sm:$0xff]  ;;  %v282_v34 = vld [vmem:[%s1445_s13 + $0x68] sm:$0xff]  ;;  %v283_v35 = vld [vmem:[%s1445_s13 + $0x70] sm:$0xff] }
  0x15   : > { %1283 = vmatpush3.bf16.msra.mxu0 %v1280_v22  ;;  %v331_v39 = vmax.f32 %v315_v36, 0.0  ;;  %v332_v2 = vmax.f32 %v316_v60, 0.0  ;;  %v318_v3 = vadd.f32 %v1468_v30, %v295_v61  ;;  %v333_v5 = vmax.f32 %v317_v62, 0.0  ;;  %v284_v42 = vld [vmem:[%s1445_s13 + $0x78] sm:$0xff] }
  0x16   : > { %1315 = vmatpush3.bf16.msra.mxu1 %v1312_v24  ;;  %1285 = vmatprep.subr.bf16.mxu0 %v1284_v32  ;;  %v335_v13 = vmax.f32 %v319_v6, 0.0  ;;  %v321_v14 = vadd.f32 %v1468_v30, %v298_v7  ;;  %v300_v15 = vmul.f32 %v1463_v29, %v277_v9  ;;  %v336_v18 = vmax.f32 %v320_v11, 0.0  ;;  %v280_v24 = vld [vmem:[%s1445_s13 + $0x58] sm:$0xff]  ;;  %s927_s13 = sshll.u32 %s1591_s29, 2 }
  0x17   : > { %1317 = vmatprep.subr.bf16.mxu1 %v1316_v33  ;;  %1188 = vmatprep.mubr.f32.mxu0 %v331_v39  ;;  %v334_v10 = vmax.f32 %v318_v3, 0.0  ;;  %v322_v19 = vadd.f32 %v1468_v30, %v299_v12  ;;  %v301_v20 = vmul.f32 %v1463_v29, %v278_v16  ;;  %v302_v23 = vmul.f32 %v1463_v29, %v279_v17  ;;  %s1557_s9 = scalar_lea.vmem %s1588_s5, %s927_s13  ;;  %s1562_s12 = scalar_lea.vmem %s1589_s6, %s927_s13 }
  0x18   : > { %1244 = vmatprep.mubr.f32.mxu1 %v331_v39  ;;  %v337_v21 = vmax.f32 %v321_v14, 0.0  ;;  %v323_v22 = vadd.f32 %v1468_v30, %v300_v15  ;;  %v303_v28 = vmul.f32 %v1463_v29, %v280_v24  ;;  %v305_v38 = vmul.f32 %v1463_v29, %v282_v34 }
  0x19   : > { %1287 = vmatpush3.bf16.msra.mxu0 %v1284_v32  ;;  %v338_v26 = vmax.f32 %v322_v19, 0.0  ;;  %v324_v27 = vadd.f32 %v1468_v30, %v301_v20  ;;  %v325_v32 = vadd.f32 %v1468_v30, %v302_v23  ;;  %v307_v45 = vmul.f32 %v1463_v29, %v284_v42 }
  0x1a   : > { %1319 = vmatpush3.bf16.msra.mxu1 %v1316_v33  ;;  %1289 = vmatprep.subr.bf16.mxu0 %v1288_v40  ;;  %v339_v31 = vmax.f32 %v323_v22, 0.0  ;;  %v304_v33 = vmul.f32 %v1463_v29, %v281_v25  ;;  %v326_v37 = vadd.f32 %v1468_v30, %v303_v28  ;;  %v328_v44 = vadd.f32 %v1468_v30, %v305_v38 }
  0x1b   : > { %1321 = vmatprep.subr.bf16.mxu1 %v1320_v41  ;;  %v340_v36 = vmax.f32 %v324_v27, 0.0  ;;  %v341_v39 = vmax.f32 %v325_v32, 0.0 }
  0x1c   : > { %v342_v43 = vmax.f32 %v326_v37, 0.0  ;;  %v344_v48 = vmax.f32 %v328_v44, 0.0 }
  0x1d   : > { %1291 = vmatpush3.bf16.msra.mxu0 %v1288_v40  ;;  %v327_v40 = vadd.f32 %v1468_v30, %v304_v33 }
  0x1e   : > { %1323 = vmatpush3.bf16.msra.mxu1 %v1320_v41  ;;  %1293 = vmatprep.subr.bf16.mxu0 %v1292_v47  ;;  %v306_v41 = vmul.f32 %v1463_v29, %v283_v35 }
  0x1f   : > { %1325 = vmatprep.subr.bf16.mxu1 %v1324_v49  ;;  %v343_v46 = vmax.f32 %v327_v40, 0.0 }
  0x21   : > { %1295 = vmatpush3.bf16.msra.mxu0 %v1292_v47  ;;  %v329_v47 = vadd.f32 %v1468_v30, %v306_v41 }
  0x22   : > { %1327 = vmatpush3.bf16.msra.mxu1 %v1324_v49  ;;  %1297 = vmatprep.subr.bf16.mxu0 %v1296_v57  ;;  %v330_v49 = vadd.f32 %v1468_v30, %v307_v45 }
  0x23   : > { %1329 = vmatprep.subr.bf16.mxu1 %v1328_v59  ;;  %v345_v50 = vmax.f32 %v329_v47, 0.0 }
  0x24   : > { %v346_v51 = vmax.f32 %v330_v49, 0.0 }
  0x25   : > { %1299 = vmatpush3.bf16.msra.mxu0 %v1296_v57 }
  0x26   : > { %1331 = vmatpush3.bf16.msra.mxu1 %v1328_v59 }
  0x28   : > { %1189 = vmatmul.mubr.f32.vlgmr.msra.gmra.mrb[0].mxu0 %v332_v2 }
  0x29   : > { %1245 = vmatmul.mubr.f32.vlgmr.msra.gmra.mrb[0].mxu1 %v332_v2  ;;  %1191 = vmatprep.mubr.f32.mxu0 %v333_v5 }
  0x2a   : > { %1247 = vmatprep.mubr.f32.mxu1 %v333_v5 }
  0x2c   : > { %1192 = vmatmul.mubr.f32.gmra.mrb[2].mxu0 %v334_v10 }
  0x2d   : > { %1248 = vmatmul.mubr.f32.gmra.mrb[2].mxu1 %v334_v10  ;;  %1194 = vmatprep.mubr.f32.mxu0 %v335_v13 }
  0x2e   : > { %1250 = vmatprep.mubr.f32.mxu1 %v335_v13 }
  0x30   : > { %1195 = vmatmul.mubr.f32.gmra.mrb[4].mxu0 %v336_v18 }
  0x31   : > { %1251 = vmatmul.mubr.f32.gmra.mrb[4].mxu1 %v336_v18  ;;  %1197 = vmatprep.mubr.f32.mxu0 %v337_v21 }
  0x32   : > { %1253 = vmatprep.mubr.f32.mxu1 %v337_v21 }
  0x34   : > { %1198 = vmatmul.mubr.f32.gmra.mrb[6].mxu0 %v338_v26 }
  0x35   : > { %1254 = vmatmul.mubr.f32.gmra.mrb[6].mxu1 %v338_v26  ;;  %1200 = vmatprep.mubr.f32.mxu0 %v339_v31 }
  0x36   : > { %1256 = vmatprep.mubr.f32.mxu1 %v339_v31 }
  0x38   : > { %1201 = vmatmul.mubr.f32.gmra.mrb[8].mxu0 %v340_v36 }
  0x39   : > { %1257 = vmatmul.mubr.f32.gmra.mrb[8].mxu1 %v340_v36  ;;  %1203 = vmatprep.mubr.f32.mxu0 %v341_v39 }
  0x3a   : > { %1259 = vmatprep.mubr.f32.mxu1 %v341_v39 }
  0x3c   : > { %1204 = vmatmul.mubr.f32.gmra.mrb[10].mxu0 %v342_v43 }
  0x3d   : > { %1260 = vmatmul.mubr.f32.gmra.mrb[10].mxu1 %v342_v43  ;;  %1206 = vmatprep.mubr.f32.mxu0 %v343_v46 }
  0x3e   : > { %1262 = vmatprep.mubr.f32.mxu1 %v343_v46 }
  0x40   : > { %1207 = vmatmul.mubr.f32.gmra.mrb[12].mxu0 %v344_v48 }
  0x41   : > { %1263 = vmatmul.mubr.f32.gmra.mrb[12].mxu1 %v344_v48  ;;  %1209 = vmatprep.mubr.f32.mxu0 %v345_v50 }
  0x42   : > { %1265 = vmatprep.mubr.f32.mxu1 %v345_v50 }
  0x44   : > { %1210 = vmatmul.mubr.f32.gmra.mrb[14].mxu0 %v346_v51 }
  0x45   : > { %1266 = vmatmul.mubr.f32.gmra.mrb[14].mxu1 %v346_v51 }
  0xfb   : > { %v1190_v29 = vpop.f32.mrb[0].mxu0 }
  0xfc   : > { %v1246_v52 = vpop.f32.mrb[0].mxu1  ;;  %v429_v30 = vpop.f32.mrb[1].mxu0 }
  0xfd   : > { %v1001_v53 = vpack.c.bf16 %v1190_v29, %v429_v30  ;;  %v670_v54 = vpop.f32.mrb[1].mxu1 }
  0xfe   : > { %v1041_v55 = vpack.c.bf16 %v1246_v52, %v670_v54 }
  0xff   : > { %1002 = vst [vmem:[%s1557_s9] sm:$0xff] %v1001_v53   ;;  %v1193_v56 = vpop.f32.mrb[2].mxu0 }
 0x100   : > { %1042 = vst [vmem:[%s1562_s12] sm:$0xff] %v1041_v55   ;;  %v1249_v57 = vpop.f32.mrb[2].mxu1  ;;  %v439_v58 = vpop.f32.mrb[3].mxu0 }
 0x101   : > { %v1006_v59 = vpack.c.bf16 %v1193_v56, %v439_v58  ;;  %v680_v60 = vpop.f32.mrb[3].mxu1 }
 0x102   : > { %v1046_v61 = vpack.c.bf16 %v1249_v57, %v680_v60 }
 0x103   : > { %1078 = vst [vmem:[%s1557_s9 + $0x8] sm:$0xff] %v1006_v59   ;;  %v1196_v62 = vpop.f32.mrb[4].mxu0 }
 0x104   : > { %1085 = vst [vmem:[%s1562_s12 + $0x8] sm:$0xff] %v1046_v61   ;;  %v1252_v63 = vpop.f32.mrb[4].mxu1  ;;  %v449_v0 = vpop.f32.mrb[5].mxu0 }
 0x105   : > { %v1011_v1 = vpack.c.bf16 %v1196_v62, %v449_v0  ;;  %v690_v2 = vpop.f32.mrb[5].mxu1 }
 0x106   : > { %v1051_v3 = vpack.c.bf16 %v1252_v63, %v690_v2 }
 0x107   : > { %1079 = vst [vmem:[%s1557_s9 + $0x10] sm:$0xff] %v1011_v1   ;;  %v1199_v4 = vpop.f32.mrb[6].mxu0 }
 0x108   : > { %1086 = vst [vmem:[%s1562_s12 + $0x10] sm:$0xff] %v1051_v3   ;;  %v1255_v5 = vpop.f32.mrb[6].mxu1  ;;  %v459_v6 = vpop.f32.mrb[7].mxu0 }
 0x109   : > { %v1016_v7 = vpack.c.bf16 %v1199_v4, %v459_v6  ;;  %v700_v8 = vpop.f32.mrb[7].mxu1 }
 0x10a   : > { %v1056_v9 = vpack.c.bf16 %v1255_v5, %v700_v8 }
 0x10b   : > { %1080 = vst [vmem:[%s1557_s9 + $0x18] sm:$0xff] %v1016_v7   ;;  %v1202_v10 = vpop.f32.mrb[8].mxu0 }
 0x10c   : > { %1087 = vst [vmem:[%s1562_s12 + $0x18] sm:$0xff] %v1056_v9   ;;  %v1258_v11 = vpop.f32.mrb[8].mxu1  ;;  %v469_v12 = vpop.f32.mrb[9].mxu0 }
 0x10d   : > { %v1021_v13 = vpack.c.bf16 %v1202_v10, %v469_v12  ;;  %v710_v14 = vpop.f32.mrb[9].mxu1 }
 0x10e   : > { %v1061_v15 = vpack.c.bf16 %v1258_v11, %v710_v14 }
 0x10f   : > { %1081 = vst [vmem:[%s1557_s9 + $0x20] sm:$0xff] %v1021_v13   ;;  %v1205_v16 = vpop.f32.mrb[10].mxu0 }
 0x110   : > { %1088 = vst [vmem:[%s1562_s12 + $0x20] sm:$0xff] %v1061_v15   ;;  %v1261_v17 = vpop.f32.mrb[10].mxu1  ;;  %v479_v18 = vpop.f32.mrb[11].mxu0 }
 0x111   : > { %v1026_v19 = vpack.c.bf16 %v1205_v16, %v479_v18  ;;  %v720_v20 = vpop.f32.mrb[11].mxu1 }
 0x112   : > { %v1066_v21 = vpack.c.bf16 %v1261_v17, %v720_v20 }
 0x113   : > { %1082 = vst [vmem:[%s1557_s9 + $0x28] sm:$0xff] %v1026_v19   ;;  %v1208_v22 = vpop.f32.mrb[12].mxu0 }
 0x114   : > { %1089 = vst [vmem:[%s1562_s12 + $0x28] sm:$0xff] %v1066_v21   ;;  %v1264_v23 = vpop.f32.mrb[12].mxu1  ;;  %v489_v24 = vpop.f32.mrb[13].mxu0 }
 0x115   : > { %v1031_v25 = vpack.c.bf16 %v1208_v22, %v489_v24  ;;  %v730_v26 = vpop.f32.mrb[13].mxu1 }
 0x116   : > { %v1071_v27 = vpack.c.bf16 %v1264_v23, %v730_v26 }
 0x117   : > { %1083 = vst [vmem:[%s1557_s9 + $0x30] sm:$0xff] %v1031_v25   ;;  %v1211_v28 = vpop.f32.mrb[14].mxu0 }
 0x118   : > { %1090 = vst [vmem:[%s1562_s12 + $0x30] sm:$0xff] %v1071_v27   ;;  %v1267_v31 = vpop.f32.mrb[14].mxu1  ;;  %v499_v32 = vpop.f32.mrb[15].mxu0 }
 0x119   : > { %v1036_v33 = vpack.c.bf16 %v1211_v28, %v499_v32  ;;  %v740_v34 = vpop.f32.mrb[15].mxu1 }
 0x11a   : > { %v1076_v35 = vpack.c.bf16 %v1267_v31, %v740_v34 }
 0x11b   : > { %1084 = vst [vmem:[%s1557_s9 + $0x38] sm:$0xff] %v1036_v33  }
 0x11c   : > { %1091 = vst [vmem:[%s1562_s12 + $0x38] sm:$0xff] %v1076_v35  }
 0x11d PF: > { %s17_s21 = sadd.s32 1, %s1346_s21  }
 0x11e   : > { %p14_p4 = scmp.ge.s32.totalorder %s17_s21, 4  }
 0x120   :  { %16 = sbr.rel (!%p14_p4) target bundleno = 1 (0x1), region = 82 }

// kernel: graphsage_forward.11
= control target key start
LH: loop header
LB: loop body
LE: loop exit
PB: predicated region body
PF: predicated region fallthrough
CT: control target
= control target key end

     0   :  { %s1427_s15 = smov 0   ;;  %s1429_s16 = smov 0   ;;  %s1827_s0 = inlined_call_operand.vmem [shape: s8[256,256], index: 0, kind: input, shape index: {}]   ;;  %s1828_s1 = inlined_call_operand.vmem [shape: bf16[256,128], index: 1, kind: input, shape index: {}]   ;;  %s1829_s2 = inlined_call_operand.vmem [shape: bf16[256,128], index: 2, kind: input, shape index: {}]   ;;  %s1830_s3 = inlined_call_operand.vmem [shape: f32[256,1], index: 3, kind: input, shape index: {}]   ;;  %s1831_s4 = inlined_call_operand.vmem [shape: f32[256,128], index: 4, kind: output, shape index: {}]  }
   0x1   :  { %s1431_s17 = smov 0  }
   0x2 LB: > { %s26_s18 = sadd.s32 1, %s1395_s16  ;;  %p1121_p0 = scmp.ge.s32.totalorder %s1399_s17, 1  ;;  %s1399_s17 = sphi %s1431_s17, %s14_s17   ;;  %s1395_s16 = sphi %s1429_s16, %s1833_s16   ;;  %s1391_s15 = sphi %s1427_s15, %s1832_s15  }
   0x3   : > { %p28_p1 = scmp.ge.s32.totalorder %s26_s18, 2  ;;  %p216_p2 = scmp.lt.s32.totalorder %s1399_s17, 3 }
   0x5   : > { %s1835_s18 = smov (%p28_p1, %s26_s18), 0  ;;  %p217_p3 = pnand %p1121_p0, %p216_p2 }
   0x6   : > { %v1297_v0 = vld [vmem:[%s1828_s1 + $0x40] sm:$0xff] (!%p217_p3)   ;;  %s1122_s21 = sshll.u32 (!%p217_p3), %s1391_s15, 2  ;;  %v1299_v2 = vld [vmem:[%s1828_s1 + $0x48] sm:$0xff] (!%p217_p3)   ;;  %v1301_v4 = vld [vmem:[%s1828_s1 + $0x50] sm:$0xff] (!%p217_p3)   ;;  %s1125_s30 = sshll.u32 (!%p217_p3), %s1391_s15, 4  ;;  %v1401_v5 = vmov (!%p217_p3), 0  }
   0x7   : > { %220 = sbr.rel (%p217_p3) target bundleno = 608 (0x260), region = 36  ;;  %v1298_v1 = vld [vmem:[%s1828_s1] sm:$0xff] (!%p217_p3)   ;;  %p264_p4 = scmp.lt.s32.totalorder (!%p217_p3), %s1122_s21, 7  ;;  %1189 = vmatprep.subr.bf16.mxu0 (!%p217_p3), %v1297_v0  ;;  %1253 = vmatprep.subr.bf16.mxu1 (!%p217_p3), %v1297_v0  ;;  %v1300_v3 = vld [vmem:[%s1828_s1 + $0x8] sm:$0xff] (!%p217_p3)   ;;  %v1302_v6 = vld [vmem:[%s1828_s1 + $0x10] sm:$0xff] (!%p217_p3)  }
   0x8   : > { %1190 = vmatpush3.bf16.msra.mxu0 (!%p217_p3), %v1298_v1  ;;  %1261 = vmatpush3.bf16.msra.mxu1 (!%p217_p3), %v1298_v1  ;;  %p281_p5 = scmp.lt.s32.totalorder (!%p217_p3), %s1125_s30, 31  ;;  %v1303_v7 = vld [vmem:[%s1828_s1 + $0x58] sm:$0xff] (!%p217_p3)   ;;  %v1305_v9 = vld [vmem:[%s1828_s1 + $0x60] sm:$0xff] (!%p217_p3)   ;;  %v1307_v11 = vld [vmem:[%s1828_s1 + $0x68] sm:$0xff] (!%p217_p3)   ;;  %v795_v1 = vlaneseq (!%p217_p3) }
   0x9   : > { %1191 = vmatprep.subr.bf16.mxu0 (!%p217_p3), %v1299_v2  ;;  %1254 = vmatprep.subr.bf16.mxu1 (!%p217_p3), %v1299_v2  ;;  %v1304_v8 = vld [vmem:[%s1828_s1 + $0x18] sm:$0xff] (!%p217_p3)   ;;  %v1306_v10 = vld [vmem:[%s1828_s1 + $0x20] sm:$0xff] (!%p217_p3)   ;;  %v1308_v16 = vld [vmem:[%s1828_s1 + $0x28] sm:$0xff] (!%p217_p3)  }
   0xa   : > { %1295 = vset.pattern.permute.xlu0 (!%p217_p3), %v1401_v5  ;;  %1296 = vset.pattern.permute.xlu1 (!%p217_p3), %v1401_v5  ;;  %v1309_v19 = vld [vmem:[%s1828_s1 + $0x70] sm:$0xff] (!%p217_p3)   ;;  %v1311_v23 = vld [vmem:[%s1828_s1 + $0x78] sm:$0xff] (!%p217_p3)  }
   0xb   : > { %v1310_v20 = vld [vmem:[%s1828_s1 + $0x30] sm:$0xff] (!%p217_p3)   ;;  %v1312_v24 = vld [vmem:[%s1828_s1 + $0x38] sm:$0xff] (!%p217_p3)  }
   0xc   : > { %1192 = vmatpush3.bf16.msra.mxu0 (!%p217_p3), %v1300_v3  ;;  %1262 = vmatpush3.bf16.msra.mxu1 (!%p217_p3), %v1300_v3 }
   0xd   : > { %1193 = vmatprep.subr.bf16.mxu0 (!%p217_p3), %v1301_v4  ;;  %1255 = vmatprep.subr.bf16.mxu1 (!%p217_p3), %v1301_v4 }
   0xe   : > { %s1837_s21 = smov (!%p264_p4, %s1122_s21), 7  ;;  %s1839_s30 = smov (!%p281_p5, %s1125_s30), 31 }
   0xf   : > { %s1149_s9 = sshll.u32 %s1837_s21, 4  ;;  %s1128_s20 = sshll.u32 %s1839_s30, 3 }
  0x10   : > { %1194 = vmatpush3.bf16.msra.mxu0 %v1302_v6  ;;  %1263 = vmatpush3.bf16.msra.mxu1 %v1302_v6  ;;  %s1481_s19 = scalar_lea.vmem %s1827_s0, %s1149_s9  ;;  %s1497_s27 = scalar_lea.vmem %s1830_s3, %s1128_s20 }
  0x11   : > { %1195 = vmatprep.subr.bf16.mxu0 %v1303_v7  ;;  %1256 = vmatprep.subr.bf16.mxu1 %v1303_v7  ;;  %v320_v12 = vld [vmem:[%s1481_s19 + $0x8] sm:$0xff]  ;;  %v651_v17 = vld [vmem:[%s1497_s27] sm:$0xff]  ;;  %v653_v18 = vld [vmem:[%s1497_s27 + $0x10] sm:$0xff]  ;;  %s1126_s13 = sshll.u32 %s1839_s30, 2  ;;  %s1770_s23 = scalar_lea.vmem %s1831_s4, %s1128_s20 }
  0x12   : > { %v324_v13 = vld [vmem:[%s1481_s19 + $0x28] sm:$0xff]  ;;  %v328_v14 = vunpack.c.l.s8.bf16 %v320_v12  ;;  %685 = vperm.xlu0 %1295, %v651_v17   ;;  %695 = vperm.xlu1 %1296, %v653_v18   ;;  %v654_v22 = vld [vmem:[%s1497_s27 + $0x18] sm:$0xff]  ;;  %v319_v25 = vld [vmem:[%s1481_s19] sm:$0xff]  ;;  %v330_v31 = vunpack.c.h.s8.bf16 %v320_v12 }
  0x13   : > { %v336_v15 = vunpack.c.l.s8.bf16 %v324_v13  ;;  %v652_v21 = vld [vmem:[%s1497_s27 + $0x8] sm:$0xff]  ;;  %v323_v26 = vld [vmem:[%s1481_s19 + $0x20] sm:$0xff]  ;;  %v327_v29 = vunpack.c.l.s8.bf16 %v319_v25  ;;  %v338_v32 = vunpack.c.h.s8.bf16 %v324_v13  ;;  %v657_v33 = vld [vmem:[%s1497_s27 + $0x30] sm:$0xff]  ;;  %v329_v39 = vunpack.c.h.s8.bf16 %v319_v25 }
  0x14   : > { %1196 = vmatpush3.bf16.msra.mxu0 %v1304_v8  ;;  %1264 = vmatpush3.bf16.msra.mxu1 %v1304_v8  ;;  %v655_v27 = vld [vmem:[%s1497_s27 + $0x20] sm:$0xff]  ;;  %v656_v28 = vld [vmem:[%s1497_s27 + $0x28] sm:$0xff]  ;;  %v335_v30 = vunpack.c.l.s8.bf16 %v323_v26  ;;  %v658_v34 = vld [vmem:[%s1497_s27 + $0x38] sm:$0xff]  ;;  %v337_v40 = vunpack.c.h.s8.bf16 %v323_v26 }
  0x15   : > { %1197 = vmatprep.subr.bf16.mxu0 %v1305_v9  ;;  %1257 = vmatprep.subr.bf16.mxu1 %v1305_v9  ;;  %v322_v35 = vld [vmem:[%s1481_s19 + $0x18] sm:$0xff]  ;;  %v659_v37 = vld [vmem:[%s1497_s27 + $0x40] sm:$0xff]  ;;  %v660_v38 = vld [vmem:[%s1497_s27 + $0x48] sm:$0xff] }
  0x16   : > { %519 = vmatprep.mubr.bf16.mxu0 %v328_v14  ;;  %551 = vmatprep.mubr.bf16.mxu1 %v336_v15  ;;  %v326_v36 = vld [vmem:[%s1481_s19 + $0x38] sm:$0xff]  ;;  %v332_v41 = vunpack.c.l.s8.bf16 %v322_v35  ;;  %v661_v43 = vld [vmem:[%s1497_s27 + $0x50] sm:$0xff]  ;;  %v663_v47 = vld [vmem:[%s1497_s27 + $0x60] sm:$0xff]  ;;  %v334_v51 = vunpack.c.h.s8.bf16 %v322_v35  ;;  %v1556_v15 = vand.u32 127, %v795_v1 }
  0x17   : > { %690 = vperm.xlu0 %1295, %v652_v21   ;;  %700 = vperm.xlu1 %1296, %v654_v22   ;;  %v340_v42 = vunpack.c.l.s8.bf16 %v326_v36  ;;  %v662_v44 = vld [vmem:[%s1497_s27 + $0x58] sm:$0xff]  ;;  %v321_v45 = vld [vmem:[%s1481_s19 + $0x10] sm:$0xff]  ;;  %v664_v48 = vld [vmem:[%s1497_s27 + $0x68] sm:$0xff]  ;;  %v342_v52 = vunpack.c.h.s8.bf16 %v326_v36 }
  0x18   : > { %1198 = vmatpush3.bf16.msra.mxu0 %v1306_v10  ;;  %1265 = vmatpush3.bf16.msra.mxu1 %v1306_v10  ;;  %v325_v46 = vld [vmem:[%s1481_s19 + $0x30] sm:$0xff]  ;;  %v331_v49 = vunpack.c.l.s8.bf16 %v321_v45  ;;  %v666_v54 = vld [vmem:[%s1497_s27 + $0x78] sm:$0xff]  ;;  %v333_v55 = vunpack.c.h.s8.bf16 %v321_v45  ;;  %s1548_s19 = scalar_lea.vmem %s1829_s2, %s1126_s13  ;;  %vm797_vm0 = vcmp.lt.s32.totalorder %v1556_v15, 8 }
  0x19   : > { %1199 = vmatprep.subr.bf16.mxu0 %v1307_v11  ;;  %1258 = vmatprep.subr.bf16.mxu1 %v1307_v11  ;;  %v339_v50 = vunpack.c.l.s8.bf16 %v325_v46  ;;  %v665_v53 = vld [vmem:[%s1497_s27 + $0x70] sm:$0xff]  ;;  %v341_v56 = vunpack.c.h.s8.bf16 %v325_v46  ;;  %v1185_v4 = vld [vmem:[%s1548_s19 + $0x20] sm:$0xff]  }
  0x1a   : > { %v1151_v5 = vld [vmem:[%s1548_s19] sm:$0xff]   ;;  %v1168_v14 = vunpack.c.l.bf16 %v1185_v4 }
  0x1b   : > { %705 = vperm.xlu0 %1295, %v655_v27   ;;  %710 = vperm.xlu1 %1296, %v656_v28  }
  0x1c   : > { %1200 = vmatpush3.bf16.msra.mxu0 %v1308_v16  ;;  %1266 = vmatpush3.bf16.msra.mxu1 %v1308_v16  ;;  %v1152_v16 = vunpack.c.l.bf16 %v1151_v5 }
  0x1d   : > { %1201 = vmatprep.subr.bf16.mxu0 %v1309_v19  ;;  %1259 = vmatprep.subr.bf16.mxu1 %v1309_v19 }
  0x1f   : > { %715 = vperm.xlu0 %1295, %v657_v33   ;;  %720 = vperm.xlu1 %1296, %v658_v34  }
  0x20   : > { %1202 = vmatpush3.bf16.msra.mxu0 %v1310_v20  ;;  %1267 = vmatpush3.bf16.msra.mxu1 %v1310_v20 }
  0x21   : > { %1203 = vmatprep.subr.bf16.mxu0 %v1311_v23  ;;  %1260 = vmatprep.subr.bf16.mxu1 %v1311_v23  ;;  %v1153_v23 = vunpack.c.h.bf16 %v1151_v5 }
  0x23   : > { %725 = vperm.xlu0 %1295, %v659_v37   ;;  %730 = vperm.xlu1 %1296, %v660_v38  }
  0x24   : > { %1204 = vmatpush3.bf16.msra.mxu0 %v1312_v24  ;;  %1268 = vmatpush3.bf16.msra.mxu1 %v1312_v24  ;;  %v1169_v24 = vunpack.c.h.bf16 %v1185_v4 }
  0x27   : > { %520 = vmatmul.mubr.bf16.vlgmr.msra.gmra.mrb[0].mxu0 %v327_v29  ;;  %552 = vmatmul.mubr.bf16.vlgmr.msra.gmra.mrb[0].mxu1 %v335_v30 }
  0x28   : > { %527 = vmatprep.mubr.bf16.mxu0 %v330_v31  ;;  %559 = vmatprep.mubr.bf16.mxu1 %v338_v32  ;;  %v1186_v31 = vld [vmem:[%s1548_s19 + $0x28] sm:$0xff]  }
  0x29   : > { %735 = vperm.xlu0 %1295, %v661_v43   ;;  %740 = vperm.xlu1 %1296, %v662_v44   ;;  %v1182_v32 = vld [vmem:[%s1548_s19 + $0x8] sm:$0xff]   ;;  %v1172_v45 = vunpack.c.l.bf16 %v1186_v31 }
  0x2a   : > { %v1156_v46 = vunpack.c.l.bf16 %v1182_v32 }
  0x2d   : > { %745 = vperm.xlu0 %1295, %v663_v47   ;;  %750 = vperm.xlu1 %1296, %v664_v48  }
  0x2f   : > { %528 = vmatmul.mubr.bf16.gmra.mrb[4].mxu0 %v329_v39  ;;  %560 = vmatmul.mubr.bf16.gmra.mrb[4].mxu1 %v337_v40 }
  0x30   : > { %535 = vmatprep.mubr.bf16.mxu0 %v332_v41  ;;  %567 = vmatprep.mubr.bf16.mxu1 %v340_v42 }
  0x31   : > { %755 = vperm.xlu0 %1295, %v665_v53   ;;  %760 = vperm.xlu1 %1296, %v666_v54  }
  0x37   : > { %536 = vmatmul.mubr.bf16.gmra.mrb[8].mxu0 %v331_v49  ;;  %568 = vmatmul.mubr.bf16.gmra.mrb[8].mxu1 %v339_v50 }
  0x38   : > { %543 = vmatprep.mubr.bf16.mxu0 %v334_v51  ;;  %575 = vmatprep.mubr.bf16.mxu1 %v342_v52 }
  0x3f   : > { %544 = vmatmul.mubr.bf16.gmra.mrb[12].mxu0 %v333_v55  ;;  %576 = vmatmul.mubr.bf16.gmra.mrb[12].mxu1 %v341_v56  ;;  %v1157_v55 = vunpack.c.h.bf16 %v1182_v32 }
  0x91   : > { %v686_v57 = vpop.permute.xlu0 %685  ;;  %v1536_v58 = vpop.permute.xlu1 %695 }
  0x96   : > { %v691_v59 = vpop.permute.xlu0 %690  ;;  %v1538_v60 = vpop.permute.xlu1 %700 }
  0x9a   : > { %v1540_v61 = vpop.permute.xlu0 %705  ;;  %v1542_v62 = vpop.permute.xlu1 %710 }
  0x9e   : > { %v1550_v63 = vpop.permute.xlu0 %715  ;;  %v1552_v0 = vpop.permute.xlu1 %720 }
  0xa2   : > { %v726_v19 = vpop.permute.xlu0 %725  ;;  %v731_v22 = vpop.permute.xlu1 %730 }
  0xa8   : > { %v736_v49 = vpop.permute.xlu0 %735  ;;  %v741_v54 = vpop.permute.xlu1 %740 }
  0xfa   : > { %v1205_v2 = vpop.f32.mrb[0].mxu0  ;;  %v1229_v3 = vpop.f32.mrb[0].mxu1 }
  0xfb   : > { %v1206_v6 = vpop.f32.mrb[1].mxu0  ;;  %v1230_v7 = vpop.f32.mrb[1].mxu1 }
  0xfc   : > { %v1207_v8 = vadd.f32 %v1206_v6, %v1205_v2  ;;  %v1231_v9 = vadd.f32 %v1230_v7, %v1229_v3  ;;  %v1208_v10 = vpop.f32.mrb[2].mxu0  ;;  %v1232_v11 = vpop.f32.mrb[2].mxu1  ;;  %v1183_v3 = vld [vmem:[%s1548_s19 + $0x10] sm:$0xff]   ;;  %v1173_v6 = vunpack.c.h.bf16 %v1186_v31 }
  0xfd   : > { %v1209_v12 = vpop.f32.mrb[3].mxu0  ;;  %v1233_v13 = vpop.f32.mrb[3].mxu1 }
  0xfe   : > { %v1210_v17 = vadd.f32 %v1209_v12, %v1208_v10  ;;  %v1234_v18 = vadd.f32 %v1233_v13, %v1232_v11  ;;  %v771_v20 = vmul.f32 %v1231_v9, %v726_v19  ;;  %v763_v21 = vmul.f32 %v1207_v8, %v686_v57 }
 0x100   : > { %v1559_v27 = vadd.f32 %v1168_v14, %v771_v20  ;;  %v1561_v28 = vadd.f32 %v1152_v16, %v763_v21  ;;  %v764_v29 = vmul.f32 %v1210_v17, %v691_v59  ;;  %v772_v30 = vmul.f32 %v1234_v18, %v731_v22  ;;  %v746_v20 = vpop.permute.xlu0 %745 }
 0x101   : > { %v1160_v17 = vunpack.c.l.bf16 %v1183_v3 }
 0x102   : > { %v1211_v25 = vpop.f32.mrb[4].mxu0  ;;  %v1235_v26 = vpop.f32.mrb[4].mxu1  ;;  %v1568_v39 = vsel %vm797_vm0, %v1559_v27, -inf  ;;  %v1573_v40 = vsel %vm797_vm0, %v1561_v28, -inf  ;;  %v1577_v43 = vadd.f32 %v1153_v23, %v764_v29  ;;  %v1579_v44 = vadd.f32 %v1169_v24, %v772_v30 }
 0x103   : > { %v1212_v33 = vpop.f32.mrb[5].mxu0  ;;  %v1236_v34 = vpop.f32.mrb[5].mxu1  ;;  %830 = vmax.xlane.f32.xlu1 %v1568_v39  ;;  %814 = vmax.xlane.f32.xlu0 %v1573_v40  ;;  %v1161_v29 = vunpack.c.h.bf16 %v1183_v3 }
 0x104   : > { %v1213_v35 = vadd.f32 %v1212_v33, %v1211_v25  ;;  %v1237_v36 = vadd.f32 %v1236_v34, %v1235_v26  ;;  %v1214_v37 = vpop.f32.mrb[6].mxu0  ;;  %v1238_v38 = vpop.f32.mrb[6].mxu1  ;;  %v1584_v50 = vsel %vm797_vm0, %v1577_v43, -inf  ;;  %v1589_v51 = vsel %vm797_vm0, %v1579_v44, -inf  ;;  %v1184_v34 = vld [vmem:[%s1548_s19 + $0x18] sm:$0xff]  }
 0x105   : > { %v1215_v41 = vpop.f32.mrb[7].mxu0  ;;  %v1239_v42 = vpop.f32.mrb[7].mxu1 }
 0x106   : > { %v1216_v47 = vadd.f32 %v1215_v41, %v1214_v37  ;;  %v1240_v48 = vadd.f32 %v1239_v42, %v1238_v38  ;;  %v773_v52 = vmul.f32 %v1237_v36, %v736_v49  ;;  %v765_v53 = vmul.f32 %v1213_v35, %v1536_v58  ;;  %v751_v26 = vpop.permute.xlu1 %750  ;;  %v1188_v35 = vld [vmem:[%s1548_s19 + $0x38] sm:$0xff]  }
 0x107   : > { %816 = vmax.xlane.f32.xlu1 %v1584_v50  ;;  %832 = vmax.xlane.f32.xlu0 %v1589_v51 }
 0x108   : > { %v1594_v59 = vadd.f32 %v1172_v45, %v773_v52  ;;  %v1596_v1 = vadd.f32 %v1156_v46, %v765_v53  ;;  %v766_v2 = vmul.f32 %v1216_v47, %v1538_v60  ;;  %v774_v58 = vmul.f32 %v1240_v48, %v741_v54  ;;  %v1187_v60 = vld [vmem:[%s1548_s19 + $0x30] sm:$0xff]  }
 0x109   : > { %v1176_v23 = vunpack.c.l.bf16 %v1187_v60  ;;  %v1177_v41 = vunpack.c.h.bf16 %v1187_v60  ;;  %v1164_v54 = vunpack.c.l.bf16 %v1184_v34 }
 0x10a   : > { %v1217_v56 = vpop.f32.mrb[8].mxu0  ;;  %v1241_v57 = vpop.f32.mrb[8].mxu1  ;;  %v1603_v11 = vsel %vm797_vm0, %v1594_v59, -inf  ;;  %v1608_v12 = vsel %vm797_vm0, %v1596_v1, -inf  ;;  %v1613_v16 = vadd.f32 %v1157_v55, %v766_v2  ;;  %v1620_v22 = vadd.f32 %v1173_v6, %v774_v58 }
 0x10b   : > { %v1218_v4 = vpop.f32.mrb[9].mxu0  ;;  %v1242_v5 = vpop.f32.mrb[9].mxu1  ;;  %834 = vmax.xlane.f32.xlu1 %v1603_v11  ;;  %818 = vmax.xlane.f32.xlu0 %v1608_v12  ;;  %v1180_v55 = vunpack.c.l.bf16 %v1188_v35  ;;  %v1165_v6 = vunpack.c.h.bf16 %v1184_v34 }
 0x10c   : > { %v1219_v7 = vadd.f32 %v1218_v4, %v1217_v56  ;;  %v1243_v8 = vadd.f32 %v1242_v5, %v1241_v57  ;;  %v1220_v9 = vpop.f32.mrb[10].mxu0  ;;  %v1244_v10 = vpop.f32.mrb[10].mxu1  ;;  %v1618_v21 = vsel %vm797_vm0, %v1613_v16, -inf }
 0x10d   : > { %v1245_v13 = vpop.f32.mrb[11].mxu1  ;;  %v1221_v14 = vpop.f32.mrb[11].mxu0 }
 0x10e   : > { %v1246_v18 = vadd.f32 %v1245_v13, %v1244_v10  ;;  %v1222_v19 = vadd.f32 %v1221_v14, %v1220_v9  ;;  %v767_v24 = vmul.f32 %v1219_v7, %v1540_v61  ;;  %v775_v25 = vmul.f32 %v1243_v8, %v746_v20  ;;  %v756_v2 = vpop.permute.xlu0 %755  ;;  %v761_v10 = vpop.permute.xlu1 %760 }
 0x10f   : > { %820 = vmax.xlane.f32.xlu0 %v1618_v21  ;;  %v1181_v13 = vunpack.c.h.bf16 %v1188_v35 }
 0x110   : > { %v1624_v32 = vadd.f32 %v1160_v17, %v767_v24  ;;  %v768_v33 = vmul.f32 %v1222_v19, %v1542_v62  ;;  %v1629_v38 = vadd.f32 %v1176_v23, %v775_v25  ;;  %v776_v42 = vmul.f32 %v1246_v18, %v751_v26 }
 0x111   : > { %v1639_v62 = vsel %vm797_vm0, %v1620_v22, -inf }
 0x112   : > { %v1223_v30 = vpop.f32.mrb[12].mxu0  ;;  %v1247_v31 = vpop.f32.mrb[12].mxu1  ;;  %v1634_v48 = vsel %vm797_vm0, %v1624_v32, -inf  ;;  %v1643_v53 = vadd.f32 %v1161_v29, %v768_v33  ;;  %v1648_v3 = vsel %vm797_vm0, %v1629_v38, -inf  ;;  %v1655_v5 = vadd.f32 %v1177_v41, %v776_v42 }
 0x113   : > { %v1224_v36 = vpop.f32.mrb[13].mxu0  ;;  %v1248_v37 = vpop.f32.mrb[13].mxu1  ;;  %822 = vmax.xlane.f32.xlu1 %v1634_v48  ;;  %836 = vmax.xlane.f32.xlu0 %v1639_v62 }
 0x114   : > { %v1225_v61 = vadd.f32 %v1224_v36, %v1223_v30  ;;  %v1249_v45 = vadd.f32 %v1248_v37, %v1247_v31  ;;  %v1226_v46 = vpop.f32.mrb[14].mxu0  ;;  %v1250_v47 = vpop.f32.mrb[14].mxu1  ;;  %v1653_v4 = vsel %vm797_vm0, %v1643_v53, -inf  ;;  %v1666_v60 = vsel %vm797_vm0, %v1655_v5, -inf }
 0x115   : > { %v1227_v49 = vpop.f32.mrb[15].mxu0  ;;  %v1251_v52 = vpop.f32.mrb[15].mxu1 }
 0x116   : > { %v1228_v56 = vadd.f32 %v1227_v49, %v1226_v46  ;;  %v1252_v57 = vadd.f32 %v1251_v52, %v1250_v47  ;;  %v769_v58 = vmul.f32 %v1225_v61, %v1550_v63  ;;  %v777_v7 = vmul.f32 %v1249_v45, %v756_v2 }
 0x117   : > { %838 = vmax.xlane.f32.xlu1 %v1648_v3  ;;  %824 = vmax.xlane.f32.xlu0 %v1653_v4 }
 0x118   : > { %v1660_v8 = vadd.f32 %v1164_v54, %v769_v58  ;;  %v770_v9 = vmul.f32 %v1228_v56, %v1552_v0  ;;  %v1673_v14 = vadd.f32 %v1180_v55, %v777_v7  ;;  %v778_v18 = vmul.f32 %v1252_v57, %v761_v10 }
 0x11a   : > { %v1671_v63 = vsel %vm797_vm0, %v1660_v8, -inf  ;;  %v1675_v17 = vadd.f32 %v1165_v6, %v770_v9  ;;  %v1682_v0 = vsel %vm797_vm0, %v1673_v14, -inf  ;;  %v1689_v20 = vadd.f32 %v1181_v13, %v778_v18 }
 0x11b   : > { %826 = vmax.xlane.f32.xlu1 %v1671_v63  ;;  %840 = vmax.xlane.f32.xlu0 %v1666_v60 }
 0x11c   : > { %v1687_v19 = vsel %vm797_vm0, %v1675_v17, -inf  ;;  %v1696_v23 = vsel %vm797_vm0, %v1689_v20, -inf }
 0x11f   : > { %842 = vmax.xlane.f32.xlu1 %v1682_v0  ;;  %828 = vmax.xlane.f32.xlu0 %v1687_v19 }
 0x123   : > { %844 = vmax.xlane.f32.xlu0 %v1696_v23 }
 0x190   : > { %v1699_v24 = vpop.xlane.xlu1 %830  ;;  %v1701_v25 = vpop.xlane.xlu0 %814 }
 0x191   : > { %v846_v26 = vsub.f32 %v1573_v40, %v1701_v25  ;;  %v854_v29 = vsub.f32 %v1568_v39, %v1699_v24 }
 0x193   : > { %v862_v30 = vmul.f32 1.442695, %v846_v26  ;;  %v878_v35 = vmul.f32 1.442695, %v854_v29 }
 0x194   : > { %v1707_v31 = vpop.xlane.xlu1 %816  ;;  %v1709_v33 = vpop.xlane.xlu0 %832 }
 0x195   : > { %v847_v15 = vsub.f32 %v1584_v50, %v1707_v31  ;;  %v855_v34 = vsub.f32 %v1589_v51, %v1709_v33  ;;  %1313 = vpow2.f32 %v862_v30 }
 0x197   : > { %v864_v36 = vmul.f32 1.442695, %v847_v15  ;;  %v880_v39 = vmul.f32 1.442695, %v855_v34 }
 0x198   : > { %v1715_v37 = vpop.xlane.xlu1 %834  ;;  %v1717_v40 = vpop.xlane.xlu0 %818 }
 0x199   : > { %1315 = vpow2.f32 %v864_v36  ;;  %v848_v41 = vsub.f32 %v1608_v12, %v1717_v40  ;;  %v856_v42 = vsub.f32 %v1603_v11, %v1715_v37 }
 0x19a   : > { %1317 = vpow2.f32 %v878_v35 }
 0x19b   : > { %v866_v50 = vmul.f32 1.442695, %v848_v41  ;;  %1319 = vpow2.f32 %v880_v39  ;;  %v882_v45 = vmul.f32 1.442695, %v856_v42 }
 0x19c   : > { %v1723_v61 = vpop.xlane.xlu0 %820 }
 0x19d   : > { %v849_v51 = vsub.f32 %v1618_v21, %v1723_v61  ;;  %1321 = vpow2.f32 %v866_v50 }
 0x19f   : > { %v868_v46 = vmul.f32 1.442695, %v849_v51  ;;  %v1314_v47 = vpop.eup %1313 }
 0x1a0   : > { %v1727_v49 = vpop.xlane.xlu1 %822  ;;  %v1729_v52 = vpop.xlane.xlu0 %836  ;;  %910 = vadd.xlane.f32.xlu1 %v1314_v47 }
 0x1a1   : > { %1323 = vpow2.f32 %v868_v46  ;;  %v850_v12 = vsub.f32 %v1634_v48, %v1727_v49  ;;  %v857_v11 = vsub.f32 %v1639_v62, %v1729_v52 }
 0x1a2   : > { %1325 = vpow2.f32 %v882_v45 }
 0x1a3   : > { %v1316_v54 = vpop.eup %1315  ;;  %v870_v55 = vmul.f32 1.442695, %v850_v12  ;;  %v884_v21 = vmul.f32 1.442695, %v857_v11 }
 0x1a4   : > { %v1318_v56 = vpop.eup %1317  ;;  %v1735_v57 = vpop.xlane.xlu1 %838  ;;  %912 = vadd.xlane.f32.xlu0 %v1316_v54 }
 0x1a5   : > { %v1737_v2 = vpop.xlane.xlu0 %824  ;;  %1327 = vpow2.f32 %v870_v55  ;;  %v858_v6 = vsub.f32 %v1648_v3, %v1735_v57  ;;  %926 = vadd.xlane.f32.xlu1 %v1318_v56  ;;  %v1320_v62 = vpop.eup %1319 }
 0x1a6   : > { %v851_v48 = vsub.f32 %v1653_v4, %v1737_v2  ;;  %1329 = vpow2.f32 %v884_v21 }
 0x1a7   : > { %v886_v58 = vmul.f32 1.442695, %v858_v6  ;;  %v1322_v9 = vpop.eup %1321 }
 0x1a8   : > { %v872_v7 = vmul.f32 1.442695, %v851_v48  ;;  %v1743_v10 = vpop.xlane.xlu1 %826  ;;  %928 = vadd.xlane.f32.xlu0 %v1320_v62  ;;  %v894_v62 = vsub.f32 %v1561_v28, %v1701_v25  ;;  %v902_v28 = vsub.f32 %v1559_v27, %v1699_v24  ;;  %v896_v27 = vsub.f32 %v1596_v1, %v1717_v40 }
 0x1a9   : > { %v1745_v13 = vpop.xlane.xlu0 %840  ;;  %1331 = vpow2.f32 %v886_v58  ;;  %v852_v18 = vsub.f32 %v1671_v63, %v1743_v10  ;;  %914 = vadd.xlane.f32.xlu1 %v1322_v9  ;;  %v904_v1 = vsub.f32 %v1594_v59, %v1715_v37  ;;  %v905_v37 = vsub.f32 %v1620_v22, %v1729_v52 }
 0x1aa   : > { %v859_v3 = vsub.f32 %v1666_v60, %v1745_v13  ;;  %1333 = vpow2.f32 %v872_v7 }
 0x1ab   : > { %v1324_v4 = vpop.eup %1323  ;;  %v874_v26 = vmul.f32 1.442695, %v852_v18 }
 0x1ac   : > { %v888_v29 = vmul.f32 1.442695, %v859_v3  ;;  %v1326_v30 = vpop.eup %1325  ;;  %v1751_v15 = vpop.xlane.xlu1 %842  ;;  %916 = vadd.xlane.f32.xlu0 %v1324_v4  ;;  %v895_v4 = vsub.f32 %v1577_v43, %v1707_v31 }
 0x1ad   : > { %v1753_v34 = vpop.xlane.xlu0 %828  ;;  %1335 = vpow2.f32 %v874_v26  ;;  %v860_v35 = vsub.f32 %v1682_v0, %v1751_v15  ;;  %930 = vadd.xlane.f32.xlu1 %v1326_v30 }
 0x1ae   : > { %v853_v63 = vsub.f32 %v1687_v19, %v1753_v34  ;;  %1337 = vpow2.f32 %v888_v29 }
 0x1af   : > { %v1328_v60 = vpop.eup %1327  ;;  %v890_v36 = vmul.f32 1.442695, %v860_v35 }
 0x1b0   : > { %v876_v39 = vmul.f32 1.442695, %v853_v63  ;;  %v1330_v41 = vpop.eup %1329 }
 0x1b1   : > { %v1759_v42 = vpop.xlane.xlu0 %844  ;;  %1339 = vpow2.f32 %v890_v36  ;;  %918 = vadd.xlane.f32.xlu1 %v1328_v60  ;;  %932 = vadd.xlane.f32.xlu0 %v1330_v41 }
 0x1b2   : > { %v861_v50 = vsub.f32 %v1696_v23, %v1759_v42  ;;  %1341 = vpow2.f32 %v876_v39  ;;  %v903_v39 = vsub.f32 %v1579_v44, %v1709_v33  ;;  %v897_v44 = vsub.f32 %v1613_v16, %v1723_v61 }
 0x1b3   : > { %v1332_v51 = vpop.eup %1331  ;;  %v898_v16 = vsub.f32 %v1624_v32, %v1727_v49 }
 0x1b4   : > { %v892_v0 = vmul.f32 1.442695, %v861_v50  ;;  %v1334_v45 = vpop.eup %1333 }
 0x1b5   : > { %934 = vadd.xlane.f32.xlu1 %v1332_v51  ;;  %920 = vadd.xlane.f32.xlu0 %v1334_v45 }
 0x1b6   : > { %1343 = vpow2.f32 %v892_v0 }
 0x1b7   : > { %v1336_v19 = vpop.eup %1335 }
 0x1b8   : > { %v1338_v46 = vpop.eup %1337 }
 0x1b9   : > { %922 = vadd.xlane.f32.xlu1 %v1336_v19  ;;  %936 = vadd.xlane.f32.xlu0 %v1338_v46 }
 0x1bb   : > { %v1340_v47 = vpop.eup %1339 }
 0x1bc   : > { %v1342_v12 = vpop.eup %1341 }
 0x1bd   : > { %938 = vadd.xlane.f32.xlu1 %v1340_v47  ;;  %924 = vadd.xlane.f32.xlu0 %v1342_v12 }
 0x1c0   : > { %v1344_v11 = vpop.eup %1343 }
 0x1c1   : > { %940 = vadd.xlane.f32.xlu0 %v1344_v11 }
 0x22d   : > { %v911_v54 = vpop.xlane.xlu1 %910 }
 0x22e   : > { %1345 = vlog2.f32 %v911_v54 }
 0x231   : > { %v913_v23 = vpop.xlane.xlu0 %912 }
 0x232   : > { %v927_v55 = vpop.xlane.xlu1 %926  ;;  %1347 = vlog2.f32 %v913_v23 }
 0x233   : > { %1349 = vlog2.f32 %v927_v55 }
 0x235   : > { %v929_v21 = vpop.xlane.xlu0 %928 }
 0x236   : > { %v915_v56 = vpop.xlane.xlu1 %914  ;;  %1351 = vlog2.f32 %v929_v21 }
 0x237   : > { %1353 = vlog2.f32 %v915_v56 }
 0x238   : > { %v1346_v6 = vpop.eup %1345 }
 0x239   : > { %v917_v48 = vpop.xlane.xlu0 %916  ;;  %v943_v58 = vmul.f32 0.6931472, %v1346_v6 }
 0x23a   : > { %v931_v7 = vpop.xlane.xlu1 %930  ;;  %1355 = vlog2.f32 %v917_v48 }
 0x23b   : > { %1357 = vlog2.f32 %v931_v7  ;;  %v974_v18 = vsub.f32 %v894_v62, %v943_v58  ;;  %v906_v62 = vsub.f32 %v1629_v38, %v1735_v57  ;;  %v899_v58 = vsub.f32 %v1643_v53, %v1737_v2 }
 0x23c   : > { %v1348_v9 = vpop.eup %1347  ;;  %v907_v57 = vsub.f32 %v1655_v5, %v1745_v13 }
 0x23d   : > { %v1350_v3 = vpop.eup %1349  ;;  %v945_v26 = vmul.f32 0.6931472, %v1348_v9  ;;  %990 = vst [vmem:[%s1770_s23] sm:$0xff] %v974_v18 }
 0x23e   : > { %v959_v25 = vmul.f32 0.6931472, %v1350_v3  ;;  %v919_v29 = vpop.xlane.xlu1 %918  ;;  %v933_v30 = vpop.xlane.xlu0 %932  ;;  %v900_v3 = vsub.f32 %v1660_v8, %v1743_v10  ;;  %v901_v8 = vsub.f32 %v1675_v17, %v1753_v34 }
 0x23f   : > { %v975_v35 = vsub.f32 %v895_v4, %v945_v26  ;;  %1359 = vlog2.f32 %v919_v29 }
 0x240   : > { %v1352_v63 = vpop.eup %1351  ;;  %v982_v60 = vsub.f32 %v902_v28, %v959_v25  ;;  %1361 = vlog2.f32 %v933_v30  ;;  %v908_v25 = vsub.f32 %v1673_v14, %v1751_v15 }
 0x241   : > { %v1354_v36 = vpop.eup %1353  ;;  %991 = vst [vmem:[%s1770_s23 + $0x8] sm:$0xff] %v975_v35  ;;  %v961_v43 = vmul.f32 0.6931472, %v1352_v63  ;;  %v909_v35 = vsub.f32 %v1689_v20, %v1759_v42 }
 0x242   : > { %998 = vst [vmem:[%s1770_s23 + $0x40] sm:$0xff] %v982_v60  ;;  %v947_v24 = vmul.f32 0.6931472, %v1354_v36  ;;  %v935_v31 = vpop.xlane.xlu1 %934  ;;  %v921_v41 = vpop.xlane.xlu0 %920 }
 0x243   : > { %v983_v50 = vsub.f32 %v903_v39, %v961_v43  ;;  %1363 = vlog2.f32 %v935_v31 }
 0x244   : > { %v1356_v51 = vpop.eup %1355  ;;  %v976_v0 = vsub.f32 %v896_v27, %v947_v24  ;;  %1365 = vlog2.f32 %v921_v41 }
 0x245   : > { %v1358_v45 = vpop.eup %1357  ;;  %999 = vst [vmem:[%s1770_s23 + $0x48] sm:$0xff] %v983_v50  ;;  %v949_v33 = vmul.f32 0.6931472, %v1356_v51 }
 0x246   : > { %992 = vst [vmem:[%s1770_s23 + $0x10] sm:$0xff] %v976_v0  ;;  %v963_v40 = vmul.f32 0.6931472, %v1358_v45  ;;  %v923_v19 = vpop.xlane.xlu1 %922  ;;  %v937_v46 = vpop.xlane.xlu0 %936 }
 0x247   : > { %v977_v47 = vsub.f32 %v897_v44, %v949_v33  ;;  %1367 = vlog2.f32 %v923_v19 }
 0x248   : > { %v984_v12 = vsub.f32 %v904_v1, %v963_v40  ;;  %1369 = vlog2.f32 %v937_v46 }
 0x249   : > { %v1360_v11 = vpop.eup %1359  ;;  %993 = vst [vmem:[%s1770_s23 + $0x18] sm:$0xff] %v977_v47 }
 0x24a   : > { %v1362_v54 = vpop.eup %1361  ;;  %1000 = vst [vmem:[%s1770_s23 + $0x50] sm:$0xff] %v984_v12  ;;  %v951_v61 = vmul.f32 0.6931472, %v1360_v11  ;;  %v939_v23 = vpop.xlane.xlu1 %938 }
 0x24b   : > { %v925_v59 = vpop.xlane.xlu0 %924  ;;  %v965_v55 = vmul.f32 0.6931472, %v1362_v54  ;;  %1371 = vlog2.f32 %v939_v23 }
 0x24c   : > { %v978_v21 = vsub.f32 %v898_v16, %v951_v61  ;;  %1373 = vlog2.f32 %v925_v59 }
 0x24d   : > { %v1364_v56 = vpop.eup %1363  ;;  %v985_v6 = vsub.f32 %v905_v37, %v965_v55 }
 0x24e   : > { %v1366_v48 = vpop.eup %1365  ;;  %994 = vst [vmem:[%s1770_s23 + $0x20] sm:$0xff] %v978_v21  ;;  %v967_v32 = vmul.f32 0.6931472, %v1364_v56 }
 0x24f   : > { %v941_v49 = vpop.xlane.xlu0 %940  ;;  %1001 = vst [vmem:[%s1770_s23 + $0x58] sm:$0xff] %v985_v6  ;;  %v953_v22 = vmul.f32 0.6931472, %v1366_v48 }
 0x250   : > { %1375 = vlog2.f32 %v941_v49  ;;  %v986_v52 = vsub.f32 %v906_v62, %v967_v32 }
 0x251   : > { %v1368_v7 = vpop.eup %1367  ;;  %v979_v9 = vsub.f32 %v899_v58, %v953_v22 }
 0x252   : > { %v1370_v18 = vpop.eup %1369  ;;  %1002 = vst [vmem:[%s1770_s23 + $0x60] sm:$0xff] %v986_v52  ;;  %v955_v38 = vmul.f32 0.6931472, %v1368_v7 }
 0x253   : > { %995 = vst [vmem:[%s1770_s23 + $0x28] sm:$0xff] %v979_v9  ;;  %v969_v53 = vmul.f32 0.6931472, %v1370_v18 }
 0x254   : > { %v980_v2 = vsub.f32 %v900_v3, %v955_v38 }
 0x255   : > { %v1372_v4 = vpop.eup %1371  ;;  %v987_v26 = vsub.f32 %v907_v57, %v969_v53 }
 0x256   : > { %v1374_v28 = vpop.eup %1373  ;;  %996 = vst [vmem:[%s1770_s23 + $0x30] sm:$0xff] %v980_v2  ;;  %v971_v29 = vmul.f32 0.6931472, %v1372_v4 }
 0x257   : > { %1003 = vst [vmem:[%s1770_s23 + $0x68] sm:$0xff] %v987_v26  ;;  %v957_v10 = vmul.f32 0.6931472, %v1374_v28 }
 0x258   : > { %v988_v5 = vsub.f32 %v908_v25, %v971_v29 }
 0x259   : > { %v981_v30 = vsub.f32 %v901_v8, %v957_v10 }
 0x25a   : > { %v1376_v13 = vpop.eup %1375  ;;  %1004 = vst [vmem:[%s1770_s23 + $0x70] sm:$0xff] %v988_v5 }
 0x25b   : > { %v973_v63 = vmul.f32 0.6931472, %v1376_v13  ;;  %997 = vst [vmem:[%s1770_s23 + $0x38] sm:$0xff] %v981_v30 }
 0x25d   : > { %v989_v60 = vsub.f32 %v909_v35, %v973_v63 }
 0x25f   : > { %1005 = vst [vmem:[%s1770_s23 + $0x78] sm:$0xff] %v989_v60 }
 0x260 PF: > { %s14_s17 = sadd.s32 1, %s1399_s17   ;;  %s1832_s15 = smov %s1395_s16 }
 0x261   : > { %p11_p6 = scmp.ge.s32.totalorder %s14_s17, 4   ;;  %s1833_s16 = smov %s1835_s18 }
 0x263   :  { %13 = sbr.rel (!%p11_p6) target bundleno = 2 (0x2), region = 83 }

</bundles_post_ra>
